<compile_context>
chip_gen: v6e
topology: v6e:2x2x1
jax: 0.10.0
libtpu: 0.0.40
codegen_flags: <defaults>
</compile_context>

<pallas_src>
import jax
import jax.numpy as jnp
from jax.experimental import pallas as pl
from jax.experimental.pallas import tpu as pltpu


def _upsample_conv3x3_kernel(x_ref, w_ref, b_ref, o_ref):
    """Fused nearest-2x upsample + 3x3 conv (phase-decomposed).

    x_ref: (1, H+2, W+2, Cp)  original-res input, 1-px zero pad, channel-padded (bf16)
    w_ref: (2, 2, 3*Cp, 2*Cp) combined weights, indexed [row phase a, vertical tap r]
    b_ref: (1, 2*Cp)          bias duplicated for the two column phases (f32)
    o_ref: (1, 2*TI, W, 2*Cp) output rows [2*r*TI, 2*(r+1)*TI); last dim packs (col
                              phase b, channel) so an HBM reshape yields NHWC for free
    """
    TI = o_ref.shape[1] // 2          # input rows per tile (output rows = 2*TI)
    W = o_ref.shape[2]
    Cp = x_ref.shape[3]
    i0 = pl.program_id(1) * TI

    # Row panel: padded input rows [i0, i0 + TI + 2)  (= original rows i0-1 .. i0+TI).
    panel = x_ref[0, pl.ds(i0, TI + 2), :, :]                      # (TI+2, W+2, Cp)

    # Three horizontal taps (cols j-1, j, j+1) concatenated along channels -> K = 3*Cp.
    taps = jnp.concatenate(
        [panel[:, 0:W, :], panel[:, 1:W + 1, :], panel[:, 2:W + 2, :]], axis=-1)

    bias = b_ref[...].astype(jnp.float32)                          # (1, 2*Cp)

    ys = []
    for a in (0, 1):                      # output row phase: rows 2*i + a
        # Two vertical taps for this phase = two leading-dim slices of the panel.
        x_r0 = taps[a:a + TI].reshape(TI * W, 3 * Cp)
        x_r1 = taps[a + 1:a + 1 + TI].reshape(TI * W, 3 * Cp)
        acc = jnp.dot(x_r0, w_ref[a, 0], preferred_element_type=jnp.float32)
        acc = acc + jnp.dot(x_r1, w_ref[a, 1], preferred_element_type=jnp.float32)
        acc = acc + bias
        ys.append(acc.reshape(TI, W, 2 * Cp))

    # Interleave the two row phases (leading-dim merge -> free) and store once.
    tile = jnp.stack(ys, axis=1).reshape(2 * TI, W, 2 * Cp)
    o_ref[0] = tile.astype(o_ref.dtype)


def _build_phase_weights(w_hwio, Cp):
    """(3,3,C,C) HWIO conv weights -> (2, 2, 3*Cp, 2*Cp) phase-combined block weights.

    Output column phase b=0 uses taps at cols (j-1, j); b=1 uses (j, j+1).
    Row phase a=0 uses rows (i-1, i); a=1 uses (i, i+1).
    """
    C = w_hwio.shape[2]
    w = jnp.zeros((3, 3, Cp, Cp), jnp.float32).at[:, :, :C, :C].set(
        w_hwio.astype(jnp.float32))
    z = jnp.zeros((Cp, Cp), jnp.float32)

    def col_blocks(v):   # v: (3, Cp, Cp) over dx, for one (a, r) vertical group
        b0 = jnp.concatenate([v[0], v[1] + v[2], z], axis=0)        # output cols 2j
        b1 = jnp.concatenate([z, v[0] + v[1], v[2]], axis=0)        # output cols 2j+1
        return jnp.concatenate([b0, b1], axis=1)                    # (3*Cp, 2*Cp)

    vert = [[w[0], w[1] + w[2]],          # a=0: input rows (i-1, i)
            [w[0] + w[1], w[2]]]          # a=1: input rows (i, i+1)
    return jnp.stack([jnp.stack([col_blocks(vert[a][r]) for r in (0, 1)])
                      for a in (0, 1)])   # (2, 2, 3*Cp, 2*Cp)


def _pick_input_tile_rows(H):
    # 2*TI output rows per grid step.  TI=8 keeps every block well under the default
    # 32 MiB scoped VMEM (and v7x's 64 MiB physical VMEM) at production shapes while
    # giving enough grid steps for double-buffered pipelining.  Tune per generation.
    for t in (8, 4, 2, 1):
        if H % t == 0:
            return t
    return 1


def upsample_forward(x_nchw, w_hwio, bias, temb=None, *,
                     compute_dtype=jnp.bfloat16):
    """Equivalent of UpSample.forward(x, temb): conv3x3(nearest_upsample_2x(x)).

    x_nchw: (N, C, H, W) float32
    w_hwio: (3, 3, C, C) float32 (w_hwio[kh, kw, i, o] == w_torch[o, i, kh, kw])
    bias:   (C,) float32
    returns (N, C, 2H, 2W) float32
    """
    del temb  # unused, matching the PyTorch module
    N, C, H, W = x_nchw.shape
    LANE = 128
    Cp = max(LANE, ((C + LANE - 1) // LANE) * LANE)   # lane-dense channel count
    TI = _pick_input_tile_rows(H)

    # ---- glue: NCHW->NHWC, channel pad, 1-px spatial zero pad, bf16 cast (one pass) ----
    x = jnp.transpose(x_nchw, (0, 2, 3, 1))
    x = jnp.pad(x, ((0, 0), (1, 1), (1, 1), (0, Cp - C)))
    x = x.astype(compute_dtype)

    wbig = _build_phase_weights(w_hwio, Cp).astype(compute_dtype)   # (2,2,3Cp,2Cp)
    bias_p = jnp.pad(bias.astype(jnp.float32), (0, Cp - C))
    bias2 = jnp.concatenate([bias_p, bias_p]).reshape(1, 2 * Cp)

    out = pl.pallas_call(
        _upsample_conv3x3_kernel,
        out_shape=jax.ShapeDtypeStruct((N, 2 * H, W, 2 * Cp), x_nchw.dtype),
        grid_spec=pltpu.PrefetchScalarGridSpec(
            num_scalar_prefetch=0,
            grid=(N, H // TI),
            in_specs=[
                # full (padded) image per batch element; constant across the row axis,
                # so it is DMA'd once per batch element and revisited from VMEM.
                pl.BlockSpec((1, H + 2, W + 2, Cp), lambda n, r: (n, 0, 0, 0)),
                pl.BlockSpec((2, 2, 3 * Cp, 2 * Cp), lambda n, r: (0, 0, 0, 0)),
                pl.BlockSpec((1, 2 * Cp), lambda n, r: (0, 0)),
            ],
            out_specs=pl.BlockSpec((1, 2 * TI, W, 2 * Cp),
                                   lambda n, r: (n, r, 0, 0)),
        ),
        compiler_params=pltpu.CompilerParams(
            dimension_semantics=("parallel", "parallel")),
    )(x, wbig, bias2)

    # Free (row-major) reshape to NHWC, drop channel padding, back to NCHW.
    y = out.reshape(N, 2 * H, 2 * W, Cp)[..., :C]
    return jnp.transpose(y, (0, 3, 1, 2))


def _reference_forward(x_nchw, w_hwio, bias):
    """Pure-JAX f32 reference (for correctness check)."""
    x = jnp.transpose(x_nchw, (0, 2, 3, 1))
    x = jnp.repeat(jnp.repeat(x, 2, axis=1), 2, axis=2)
    y = jax.lax.conv_general_dilated(
        x, w_hwio,
        window_strides=(1, 1),
        padding=((1, 1), (1, 1)),
        dimension_numbers=("NHWC", "HWIO", "NHWC"),
    ) + bias.reshape(1, 1, 1, -1)
    return jnp.transpose(y, (0, 3, 1, 2))


if __name__ == "__main__":
    key = jax.random.PRNGKey(0)
    k_x, k_w, k_b = jax.random.split(key, 3)

    N, C, H, W = 2, 4, 16, 16  # small shapes; dim == C == 4

    x = jax.random.normal(k_x, (N, C, H, W), dtype=jnp.float32)
    # Deterministic parameter init (PyTorch-like uniform bound 1/sqrt(fan_in)).
    fan_in = C * 3 * 3
    bound = 1.0 / (fan_in ** 0.5)
    w_hwio = jax.random.uniform(k_w, (3, 3, C, C), jnp.float32, -bound, bound)
    bias = jax.random.uniform(k_b, (C,), jnp.float32, -bound, bound)

    fwd = jax.jit(upsample_forward)
    out = jax.block_until_ready(fwd(x, w_hwio, bias))

    ref = _reference_forward(x, w_hwio, bias)
    assert out.shape == (N, C, 2 * H, 2 * W)
    err = float(jnp.max(jnp.abs(out - ref)))
    # bf16 matmul operands (f32 accumulate) vs. an f32 reference -> bf16-level tolerance.
    assert err < 5e-2, f"max abs error {err}"

    print("KERNEL_OK")
</pallas_src>

<mosaic_0001>
module attributes {stable_mosaic.version = 11 : i64} {
  func.func @_upsample_conv3x3_kernel(%arg0: i32, %arg1: i32, %arg2: memref<1x18x18x128xbf16, #tpu.memory_space<vmem>>, %arg3: memref<2x2x384x256xbf16, #tpu.memory_space<vmem>>, %arg4: memref<1x256xf32, #tpu.memory_space<vmem>>, %arg5: memref<1x16x16x256xf32, #tpu.memory_space<vmem>>) attributes {dimension_semantics = [#tpu.dimension_semantics<parallel>, #tpu.dimension_semantics<parallel>], iteration_bounds = array<i64: 2, 2>, scalar_prefetch = 0 : i64, scratch_operands = 0 : i64, tpu.core_type = #tpu.core_type<tc>, window_params = [{transform_indices = @transform_0, window_bounds = array<i64: 1, 18, 18, 128>}, {pipeline_mode = #tpu.pipeline_mode<synchronous>, transform_indices = @transform_1, window_bounds = array<i64: 2, 2, 384, 256>}, {pipeline_mode = #tpu.pipeline_mode<synchronous>, transform_indices = @transform_2, window_bounds = array<i64: 1, 256>}, {transform_indices = @transform_3, window_bounds = array<i64: 1, 16, 16, 256>}]} {
    %c8_i32 = arith.constant 8 : i32
    %0 = arith.muli %arg1, %c8_i32 : i32
    %c0 = arith.constant 0 : index
    %1 = arith.index_cast %0 : i32 to index
    %c0_0 = arith.constant 0 : index
    %c0_1 = arith.constant 0 : index
    %2 = vector.load %arg2[%c0, %1, %c0_0, %c0_1] : memref<1x18x18x128xbf16, #tpu.memory_space<vmem>>, vector<1x10x18x128xbf16>
    %3 = vector.shape_cast %2 : vector<1x10x18x128xbf16> to vector<10x18x128xbf16>
    %4 = vector.extract_strided_slice %3 {offsets = [0, 0, 0], sizes = [10, 16, 128], strides = [1, 1, 1]} : vector<10x18x128xbf16> to vector<10x16x128xbf16>
    %5 = vector.extract_strided_slice %3 {offsets = [0, 1, 0], sizes = [10, 16, 128], strides = [1, 1, 1]} : vector<10x18x128xbf16> to vector<10x16x128xbf16>
    %6 = vector.extract_strided_slice %3 {offsets = [0, 2, 0], sizes = [10, 16, 128], strides = [1, 1, 1]} : vector<10x18x128xbf16> to vector<10x16x128xbf16>
    %7 = tpu.concatenate %4, %5, %6 in 2 : vector<10x16x128xbf16>, vector<10x16x128xbf16>, vector<10x16x128xbf16> -> vector<10x16x384xbf16>
    %c0_2 = arith.constant 0 : index
    %c0_3 = arith.constant 0 : index
    %8 = vector.load %arg4[%c0_2, %c0_3] : memref<1x256xf32, #tpu.memory_space<vmem>>, vector<1x256xf32>
    %9 = vector.extract_strided_slice %7 {offsets = [0, 0, 0], sizes = [8, 16, 384], strides = [1, 1, 1]} : vector<10x16x384xbf16> to vector<8x16x384xbf16>
    %10 = vector.shape_cast %9 : vector<8x16x384xbf16> to vector<128x384xbf16>
    %11 = vector.extract_strided_slice %7 {offsets = [1, 0, 0], sizes = [8, 16, 384], strides = [1, 1, 1]} : vector<10x16x384xbf16> to vector<8x16x384xbf16>
    %12 = vector.shape_cast %11 : vector<8x16x384xbf16> to vector<128x384xbf16>
    %c0_4 = arith.constant 0 : index
    %c0_5 = arith.constant 0 : index
    %c0_6 = arith.constant 0 : index
    %c0_7 = arith.constant 0 : index
    %13 = vector.load %arg3[%c0_4, %c0_5, %c0_6, %c0_7] : memref<2x2x384x256xbf16, #tpu.memory_space<vmem>>, vector<1x1x384x256xbf16>
    %14 = vector.shape_cast %13 : vector<1x1x384x256xbf16> to vector<384x256xbf16>
    %cst = arith.constant dense<0.000000e+00> : vector<128x256xf32>
    %15 = tpu.matmul %10, %14, %cst {dimension_numbers = #tpu.dot_dimension_numbers<[1], [0], [0], [1], [0, 0, 1, 1], [], []>} : vector<128x384xbf16>, vector<384x256xbf16>, vector<128x256xf32> -> vector<128x256xf32>
    %c0_8 = arith.constant 0 : index
    %c1 = arith.constant 1 : index
    %c0_9 = arith.constant 0 : index
    %c0_10 = arith.constant 0 : index
    %16 = vector.load %arg3[%c0_8, %c1, %c0_9, %c0_10] : memref<2x2x384x256xbf16, #tpu.memory_space<vmem>>, vector<1x1x384x256xbf16>
    %17 = vector.shape_cast %16 : vector<1x1x384x256xbf16> to vector<384x256xbf16>
    %cst_11 = arith.constant dense<0.000000e+00> : vector<128x256xf32>
    %18 = tpu.matmul %12, %17, %cst_11 {dimension_numbers = #tpu.dot_dimension_numbers<[1], [0], [0], [1], [0, 0, 1, 1], [], []>} : vector<128x384xbf16>, vector<384x256xbf16>, vector<128x256xf32> -> vector<128x256xf32>
    %19 = arith.addf %15, %18 : vector<128x256xf32>
    %20 = vector.broadcast %8 : vector<1x256xf32> to vector<128x256xf32>
    %21 = arith.addf %19, %20 : vector<128x256xf32>
    %22 = vector.shape_cast %21 : vector<128x256xf32> to vector<8x16x256xf32>
    %23 = vector.extract_strided_slice %7 {offsets = [1, 0, 0], sizes = [8, 16, 384], strides = [1, 1, 1]} : vector<10x16x384xbf16> to vector<8x16x384xbf16>
    %24 = vector.shape_cast %23 : vector<8x16x384xbf16> to vector<128x384xbf16>
    %25 = vector.extract_strided_slice %7 {offsets = [2, 0, 0], sizes = [8, 16, 384], strides = [1, 1, 1]} : vector<10x16x384xbf16> to vector<8x16x384xbf16>
    %26 = vector.shape_cast %25 : vector<8x16x384xbf16> to vector<128x384xbf16>
    %c1_12 = arith.constant 1 : index
    %c0_13 = arith.constant 0 : index
    %c0_14 = arith.constant 0 : index
    %c0_15 = arith.constant 0 : index
    %27 = vector.load %arg3[%c1_12, %c0_13, %c0_14, %c0_15] : memref<2x2x384x256xbf16, #tpu.memory_space<vmem>>, vector<1x1x384x256xbf16>
    %28 = vector.shape_cast %27 : vector<1x1x384x256xbf16> to vector<384x256xbf16>
    %cst_16 = arith.constant dense<0.000000e+00> : vector<128x256xf32>
    %29 = tpu.matmul %24, %28, %cst_16 {dimension_numbers = #tpu.dot_dimension_numbers<[1], [0], [0], [1], [0, 0, 1, 1], [], []>} : vector<128x384xbf16>, vector<384x256xbf16>, vector<128x256xf32> -> vector<128x256xf32>
    %c1_17 = arith.constant 1 : index
    %c1_18 = arith.constant 1 : index
    %c0_19 = arith.constant 0 : index
    %c0_20 = arith.constant 0 : index
    %30 = vector.load %arg3[%c1_17, %c1_18, %c0_19, %c0_20] : memref<2x2x384x256xbf16, #tpu.memory_space<vmem>>, vector<1x1x384x256xbf16>
    %31 = vector.shape_cast %30 : vector<1x1x384x256xbf16> to vector<384x256xbf16>
    %cst_21 = arith.constant dense<0.000000e+00> : vector<128x256xf32>
    %32 = tpu.matmul %26, %31, %cst_21 {dimension_numbers = #tpu.dot_dimension_numbers<[1], [0], [0], [1], [0, 0, 1, 1], [], []>} : vector<128x384xbf16>, vector<384x256xbf16>, vector<128x256xf32> -> vector<128x256xf32>
    %33 = arith.addf %29, %32 : vector<128x256xf32>
    %34 = vector.broadcast %8 : vector<1x256xf32> to vector<128x256xf32>
    %35 = arith.addf %33, %34 : vector<128x256xf32>
    %36 = vector.shape_cast %35 : vector<128x256xf32> to vector<8x16x256xf32>
    %37 = vector.shape_cast %22 : vector<8x16x256xf32> to vector<8x1x16x256xf32>
    %38 = vector.shape_cast %36 : vector<8x16x256xf32> to vector<8x1x16x256xf32>
    %39 = tpu.concatenate %37, %38 in 1 : vector<8x1x16x256xf32>, vector<8x1x16x256xf32> -> vector<8x2x16x256xf32>
    %40 = vector.shape_cast %39 : vector<8x2x16x256xf32> to vector<16x16x256xf32>
    %c0_22 = arith.constant 0 : index
    %c0_23 = arith.constant 0 : index
    %c0_24 = arith.constant 0 : index
    %c0_25 = arith.constant 0 : index
    %41 = vector.load %arg5[%c0_22, %c0_23, %c0_24, %c0_25] : memref<1x16x16x256xf32, #tpu.memory_space<vmem>>, vector<1x16x16x256xf32>
    %42 = vector.shape_cast %41 : vector<1x16x16x256xf32> to vector<16x16x256xf32>
    %43 = vector.shape_cast %40 : vector<16x16x256xf32> to vector<1x16x16x256xf32>
    tpu.vector_store %arg5[%c0_22, %c0_23, %c0_24, %c0_25], %43 {strides = array<i32>} : memref<1x16x16x256xf32, #tpu.memory_space<vmem>>, vector<1x16x16x256xf32>,
    return
  }
  func.func @transform_0(%arg0: i32, %arg1: i32) -> (i32, i32, i32, i32) {
    %c0_i32 = arith.constant 0 : i32
    %c0_i32_0 = arith.constant 0 : i32
    %c0_i32_1 = arith.constant 0 : i32
    %c0_i32_2 = arith.constant 0 : i32
    return %arg0, %c0_i32, %c0_i32_0, %c0_i32_1 : i32, i32, i32, i32
  }
  func.func @transform_1(%arg0: i32, %arg1: i32) -> (i32, i32, i32, i32) {
    %c0_i32 = arith.constant 0 : i32
    %c0_i32_0 = arith.constant 0 : i32
    %c0_i32_1 = arith.constant 0 : i32
    %c0_i32_2 = arith.constant 0 : i32
    %c0_i32_3 = arith.constant 0 : i32
    return %c0_i32, %c0_i32_0, %c0_i32_1, %c0_i32_2 : i32, i32, i32, i32
  }
  func.func @transform_2(%arg0: i32, %arg1: i32) -> (i32, i32) {
    %c0_i32 = arith.constant 0 : i32
    %c0_i32_0 = arith.constant 0 : i32
    %c0_i32_1 = arith.constant 0 : i32
    return %c0_i32, %c0_i32_0 : i32, i32
  }
  func.func @transform_3(%arg0: i32, %arg1: i32) -> (i32, i32, i32, i32) {
    %c0_i32 = arith.constant 0 : i32
    %c0_i32_0 = arith.constant 0 : i32
    %c0_i32_1 = arith.constant 0 : i32
    return %arg0, %arg1, %c0_i32, %c0_i32_0 : i32, i32, i32, i32
  }
}

</mosaic_0001>

<bundles_post_ra>
// kernel: upsample_forward.1
= control target key start
LH: loop header
LB: loop body
LE: loop exit
PB: predicated region body
PF: predicated region fallthrough
CT: control target
= control target key end

     0   :  { %s3591_s12 = smov 0   ;;  %s3593_s13 = smov 0   ;;  %s5225_s0 = inlined_call_operand.vmem [shape: bf16[2,18,18,128], index: 0, kind: input, shape index: {}]   ;;  %s5226_s1 = inlined_call_operand.vmem [shape: bf16[2,2,384,256], index: 1, kind: input, shape index: {}]   ;;  %s5227_s2 = inlined_call_operand.vmem [shape: f32[1,256], index: 2, kind: input, shape index: {}]   ;;  %s5228_s3 = inlined_call_operand.vmem [shape: f32[2,32,16,256], index: 3, kind: output, shape index: {}]  }
   0x1   :  { %s3595_s14 = smov 0   ;;  %s3597_s15 = smov 0  }
   0x2   :  { %s3599_s16 = smov 0  }
   0x3 LB: > { %s22_s17 = sadd.s32 1, %s3560_s14  ;;  %s25_s18 = sadd.s32 1, %s3564_s15  ;;  %s3568_s16 = sphi %s3599_s16, %s13_s16   ;;  %s3564_s15 = sphi %s3597_s15, %s5346_s15   ;;  %s3560_s14 = sphi %s3595_s14, %s5345_s14   ;;  %s3556_s13 = sphi %s3593_s13, %s5344_s13   ;;  %s3552_s12 = sphi %s3591_s12, %s5343_s12  }
   0x4   : > { %p23_p0 = scmp.ge.s32.totalorder %s22_s17, 2  ;;  %p2788_p1 = scmp.ge.s32.totalorder %s3568_s16, 1 }
   0x5   : > { %p151_p2 = scmp.lt.s32.totalorder %s3568_s16, 5 }
   0x6   : > { %s5348_s17 = smov (%p23_p0, %s22_s17), 0  ;;  %s5350_s18 = smov (!%p23_p0, %s25_s18), %s3564_s15 }
   0x7   : > { %p152_p3 = pnand %p2788_p1, %p151_p2  ;;  %p27_p4 = scmp.ge.s32.totalorder %s5350_s18, 2 }
   0x9   : > { %s5352_s18 = smov (%p27_p4, %s5350_s18), 0  ;;  %155 = sbr.rel (%p152_p3) target bundleno = 516 (0x204), region = 32 }
   0xe   : > { %v3214_v0 = vld [vmem:[%s5226_s1 + $0x1f4] ss:$8 sps:$4 sm:$0xff]   ;;  %v3570_v2 = vmov 0   ;;  %v3218_v3 = vld [vmem:[%s5226_s1 + $0x1f0] ss:$8 sps:$4 sm:$0xff]   ;;  %p180_p5 = scmp.lt.s32.totalorder %s3556_s13, 1 }
   0xf   : > { %v3216_v1 = vld [vmem:[%s5226_s1 + $0x2f4] ss:$8 sps:$4 sm:$0xff]   ;;  %976 = vmatprep.mubr.bf16.mxu1 %v3570_v2  ;;  %831 = vmatprep.subr.bf16.mxu0 %v3214_v0  ;;  %v3219_v4 = vld [vmem:[%s5226_s1 + $0x2f0] ss:$8 sps:$4 sm:$0xff]   ;;  %v3220_v5 = vld [vmem:[%s5226_s1 + $0x1e4] ss:$8 sps:$4 sm:$0xff]  }
  0x10   : > { %944 = vmatprep.subr.bf16.mxu1 %v3216_v1  ;;  %832 = vmatpush1.bf16.msra.mxu0 %v3218_v3  ;;  %v3222_v6 = vld [vmem:[%s5226_s1 + $0x2e4] ss:$8 sps:$4 sm:$0xff]   ;;  %v3224_v7 = vld [vmem:[%s5226_s1 + $0x1e0] ss:$8 sps:$4 sm:$0xff]   ;;  %v3226_v9 = vld [vmem:[%s5226_s1 + $0x1d4] ss:$8 sps:$4 sm:$0xff]  }
  0x11   : > { %945 = vmatpush1.bf16.msra.mxu1 %v3219_v4  ;;  %833 = vmatprep.subr.bf16.mxu0 %v3220_v5  ;;  %v3225_v8 = vld [vmem:[%s5226_s1 + $0x2e0] ss:$8 sps:$4 sm:$0xff]   ;;  %v3228_v10 = vld [vmem:[%s5226_s1 + $0x2d4] ss:$8 sps:$4 sm:$0xff]   ;;  %v3230_v11 = vld [vmem:[%s5226_s1 + $0x1d0] ss:$8 sps:$4 sm:$0xff]  }
  0x12   : > { %946 = vmatprep.subr.bf16.mxu1 %v3222_v6  ;;  %v3231_v12 = vld [vmem:[%s5226_s1 + $0x2d0] ss:$8 sps:$4 sm:$0xff]   ;;  %v3232_v13 = vld [vmem:[%s5226_s1 + $0x1c4] ss:$8 sps:$4 sm:$0xff]   ;;  %s5354_s13 = smov (!%p180_p5, %s3556_s13), 1  ;;  %s3155_s22 = smul.u32 96, %s3552_s12 }
  0x13   : > { %v3234_v14 = vld [vmem:[%s5226_s1 + $0x2c4] ss:$8 sps:$4 sm:$0xff]   ;;  %v3236_v15 = vld [vmem:[%s5226_s1 + $0x1c0] ss:$8 sps:$4 sm:$0xff]   ;;  %v3238_v17 = vld [vmem:[%s5226_s1 + $0x1b4] ss:$8 sps:$4 sm:$0xff]  }
  0x14   : > { %834 = vmatpush1.bf16.msra.mxu0 %v3224_v7  ;;  %v3237_v16 = vld [vmem:[%s5226_s1 + $0x2c0] ss:$8 sps:$4 sm:$0xff]   ;;  %v3240_v18 = vld [vmem:[%s5226_s1 + $0x2b4] ss:$8 sps:$4 sm:$0xff]   ;;  %s3172_s8 = smul.u32 216, %s5354_s13  ;;  %vm452_vm1 = vcmask 1046528  }
  0x15   : > { %947 = vmatpush1.bf16.msra.mxu1 %v3225_v8  ;;  %835 = vmatprep.subr.bf16.mxu0 %v3226_v9  ;;  %v3242_v19 = vld [vmem:[%s5226_s1 + $0x1b0] ss:$8 sps:$4 sm:$0xff]   ;;  %v3244_v21 = vld [vmem:[%s5226_s1 + $0x1a4] ss:$8 sps:$4 sm:$0xff]   ;;  %v3248_v23 = vld [vmem:[%s5226_s1 + $0x1a0] ss:$8 sps:$4 sm:$0xff]  }
  0x16   : > { %948 = vmatprep.subr.bf16.mxu1 %v3228_v10  ;;  %v3243_v20 = vld [vmem:[%s5226_s1 + $0x2b0] ss:$8 sps:$4 sm:$0xff]   ;;  %v3246_v22 = vld [vmem:[%s5226_s1 + $0x2a4] ss:$8 sps:$4 sm:$0xff]   ;;  %s184_s27 = scalar_lea.vmem %s5225_s0, %s3172_s8  ;;  %v3249_v24 = vld [vmem:[%s5226_s1 + $0x2a0] ss:$8 sps:$4 sm:$0xff]  }
  0x17   : > { %v3250_v25 = vld [vmem:[%s5226_s1 + $0x194] ss:$8 sps:$4 sm:$0xff]   ;;  %s3710_s7 = scalar_lea.vmem %s184_s27, %s3155_s22  ;;  %v3254_v27 = vld [vmem:[%s5226_s1 + $0x190] ss:$8 sps:$4 sm:$0xff]   ;;  %v3256_v31 = vld [vmem:[%s5226_s1 + $0x184] ss:$8 sps:$4 sm:$0xff]  }
  0x18   : > { %836 = vmatpush1.bf16.msra.mxu0 %v3230_v11  ;;  %v3252_v26 = vld [vmem:[%s5226_s1 + $0x294] ss:$8 sps:$4 sm:$0xff]   ;;  %v3255_v28 = vld [vmem:[%s5226_s1 + $0x290] ss:$8 sps:$4 sm:$0xff]   ;;  %v3258_v32 = vld [vmem:[%s5226_s1 + $0x284] ss:$8 sps:$4 sm:$0xff]  }
  0x19   : > { %949 = vmatpush1.bf16.msra.mxu1 %v3231_v12  ;;  %837 = vmatprep.subr.bf16.mxu0 %v3232_v13  ;;  %v3722_v29 = vld [vmem:[%s3710_s7 + $0xc] sm:$0xff]   ;;  %v3265_v30 = vld [vmem:[%s3710_s7 + $0x14] ss:$0 sps:$4 sm:$0x11]   ;;  %vm321_vm0 = vsmask.f32 7424 }
  0x1a   : > { %950 = vmatprep.subr.bf16.mxu1 %v3234_v14  ;;  %v3260_v33 = vld [vmem:[%s5226_s1 + $0x180] ss:$8 sps:$4 sm:$0xff]   ;;  %v335_v34 = vshrl.u32 %v3722_v29, 16  ;;  %v337_v35 = vshll.u32 %v3722_v29, 16  ;;  %v342_v37 = vshll.u32 %v3265_v30, 16  ;;  %v456_v39 = vrot.slane %v3722_v29, 1 }
  0x1b   : > { %v3261_v36 = vld [vmem:[%s5226_s1 + $0x280] ss:$8 sps:$4 sm:$0xff]   ;;  %v3262_v38 = vld [vmem:[%s5226_s1 + $0x274] ss:$8 sps:$4 sm:$0xff]   ;;  %v457_v40 = vrot.slane %v3265_v30, 1  ;;  %s2792_s26 = sshll.u32 %s5354_s13, 7 }
  0x1c   : > { %838 = vmatpush1.bf16.msra.mxu0 %v3236_v15  ;;  %v339_v41 = vrot.slane %v337_v35, 1  ;;  %v3268_v42 = vld [vmem:[%s5226_s1 + $0x74] ss:$8 sps:$4 sm:$0xff]   ;;  %v344_v43 = vrot.slane %v342_v37, 1  ;;  %v3266_v44 = vld [vmem:[%s5226_s1 + $0x70] ss:$8 sps:$4 sm:$0xff]  }
  0x1d   : > { %951 = vmatpush1.bf16.msra.mxu1 %v3237_v16  ;;  %839 = vmatprep.subr.bf16.mxu0 %v3238_v17  ;;  %v3269_v46 = vld [vmem:[%s5226_s1 + $0x270] ss:$8 sps:$4 sm:$0xff]   ;;  %v3753_v47 = vsel %vm452_vm1, %v456_v39, %v457_v40  ;;  %v3759_v49 = vld [vmem:[%s3710_s7 + $0x20] ss:$0 sps:$4 sm:$0x11]   ;;  %v3800_v63 = vld [vmem:[%s3710_s7 + $0x24] sm:$0xff]  }
  0x1e   : > { %952 = vmatprep.subr.bf16.mxu1 %v3240_v18  ;;  %v340_v45 = vor.u32 %v339_v41, %v335_v34  ;;  %v3756_v48 = vld [vmem:[%s3710_s7 + $0x18] sm:$0xff]   ;;  %v3270_v51 = vld [vmem:[%s5226_s1 + $0x264] ss:$8 sps:$4 sm:$0xff]   ;;  %v3272_v53 = vld [vmem:[%s5226_s1 + $0x60] ss:$8 sps:$4 sm:$0xff]   ;;  %v460_v57 = vrot.slane %v3759_v49, 1 }
  0x1f   : > { %v3274_v52 = vld [vmem:[%s5226_s1 + $0x64] ss:$8 sps:$4 sm:$0xff]   ;;  %v3275_v54 = vld [vmem:[%s5226_s1 + $0x260] ss:$8 sps:$4 sm:$0xff]   ;;  %v3276_v55 = vld [vmem:[%s5226_s1 + $0x254] ss:$8 sps:$4 sm:$0xff]  }
  0x20   : > { %840 = vmatpush1.bf16.msra.mxu0 %v3242_v19  ;;  %v3762_v50 = vsel %vm321_vm0, %v340_v45, %v344_v43  ;;  %v459_v56 = vrot.slane %v3756_v48, 1  ;;  %v3282_v58 = vld [vmem:[%s5226_s1 + $0x54] ss:$8 sps:$4 sm:$0xff]   ;;  %v3280_v59 = vld [vmem:[%s5226_s1 + $0x50] ss:$8 sps:$4 sm:$0xff]   ;;  %v462_v6 = vrot.slane %v3800_v63, 1 }
  0x21   : > { %953 = vmatpush1.bf16.msra.mxu1 %v3243_v20  ;;  %841 = vmatprep.subr.bf16.mxu0 %v3244_v21  ;;  %v3283_v60 = vld [vmem:[%s5226_s1 + $0x250] ss:$8 sps:$4 sm:$0xff]   ;;  %v3284_v61 = vld [vmem:[%s5226_s1 + $0x244] ss:$8 sps:$4 sm:$0xff]   ;;  %v3286_v3 = vld [vmem:[%s5226_s1 + $0x40] ss:$8 sps:$4 sm:$0xff]  }
  0x22   : > { %954 = vmatprep.subr.bf16.mxu1 %v3246_v22  ;;  %863 = vmatprep.mubr.bf16.mxu0 %v3762_v50  ;;  %v3797_v62 = vsel %vm452_vm1, %v459_v56, %v460_v57  ;;  %v3803_v0 = vld [vmem:[%s3710_s7 + $0x2c] ss:$0 sps:$4 sm:$0x11]   ;;  %v3289_v4 = vld [vmem:[%s5226_s1 + $0x240] ss:$8 sps:$4 sm:$0xff]   ;;  %v3831_v11 = vld [vmem:[%s3710_s7 + $0x30] sm:$0xff]  }
  0x23   : > { %v3288_v1 = vld [vmem:[%s5226_s1 + $0x44] ss:$8 sps:$4 sm:$0xff]   ;;  %v3290_v5 = vld [vmem:[%s5226_s1 + $0x234] ss:$8 sps:$4 sm:$0xff]   ;;  %v463_v7 = vrot.slane %v3803_v0, 1  ;;  %v465_v18 = vrot.slane %v3831_v11, 1 }
  0x24   : > { %842 = vmatpush1.bf16.msra.mxu0 %v3248_v23  ;;  %v3296_v8 = vld [vmem:[%s5226_s1 + $0x34] ss:$8 sps:$4 sm:$0xff]   ;;  %v3294_v9 = vld [vmem:[%s5226_s1 + $0x30] ss:$8 sps:$4 sm:$0xff]   ;;  %v3298_v14 = vld [vmem:[%s5226_s1 + $0x224] ss:$8 sps:$4 sm:$0xff]  }
  0x25   : > { %955 = vmatpush1.bf16.msra.mxu1 %v3249_v24  ;;  %843 = vmatprep.subr.bf16.mxu0 %v3250_v25  ;;  %v3297_v10 = vld [vmem:[%s5226_s1 + $0x230] ss:$8 sps:$4 sm:$0xff]   ;;  %v3834_v12 = vsel %vm452_vm1, %v462_v6, %v463_v7  ;;  %v3302_v15 = vld [vmem:[%s5226_s1 + $0x24] ss:$8 sps:$4 sm:$0xff]   ;;  %v3300_v16 = vld [vmem:[%s5226_s1 + $0x20] ss:$8 sps:$4 sm:$0xff]  }
  0x26   : > { %956 = vmatprep.subr.bf16.mxu1 %v3252_v26  ;;  %v3837_v13 = vld [vmem:[%s3710_s7 + $0x38] ss:$0 sps:$4 sm:$0x11]   ;;  %v3303_v17 = vld [vmem:[%s5226_s1 + $0x220] ss:$8 sps:$4 sm:$0xff]   ;;  %v349_v24 = vshll.u32 %v3756_v48, 16 }
  0x27   : > { %v466_v19 = vrot.slane %v3837_v13, 1  ;;  %v3304_v20 = vld [vmem:[%s5226_s1 + $0x214] ss:$8 sps:$4 sm:$0xff]   ;;  %v3308_v22 = vld [vmem:[%s5226_s1 + $0x10] ss:$8 sps:$4 sm:$0xff]   ;;  %v361_v34 = vshll.u32 %v3800_v63, 16 }
  0x28   : > { %844 = vmatpush1.bf16.msra.mxu0 %v3254_v27  ;;  %v3310_v21 = vld [vmem:[%s5226_s1 + $0x14] ss:$8 sps:$4 sm:$0xff]   ;;  %v3311_v23 = vld [vmem:[%s5226_s1 + $0x210] ss:$8 sps:$4 sm:$0xff]   ;;  %v3312_v25 = vld [vmem:[%s5226_s1 + $0x204] ss:$8 sps:$4 sm:$0xff]  }
  0x29   : > { %957 = vmatpush1.bf16.msra.mxu1 %v3255_v28  ;;  %845 = vmatprep.subr.bf16.mxu0 %v3256_v31  ;;  %v3872_v26 = vld [vmem:[%s3710_s7 + $0x3c] sm:$0xff]   ;;  %v3875_v27 = vsel %vm452_vm1, %v465_v18, %v466_v19  ;;  %v3878_v28 = vld [vmem:[%s3710_s7 + $0x44] ss:$0 sps:$4 sm:$0x11]   ;;  %v347_v31 = vshrl.u32 %v3756_v48, 16  ;;  %v3909_v45 = vld [vmem:[%s3710_s7 + $0x48] sm:$0xff]  }
  0x2a   : > { %958 = vmatprep.subr.bf16.mxu1 %v3258_v32  ;;  %v3316_v30 = vld [vmem:[%s5226_s1 + $0x4] ss:$8 sps:$4 sm:$0xff]   ;;  %v351_v32 = vrot.slane %v349_v24, 1  ;;  %v3314_v35 = vld [vmem:[%s5226_s1] ss:$8 sps:$4 sm:$0xff]   ;;  %v468_v37 = vrot.slane %v3872_v26, 1 }
  0x2b   : > { %v3322_v39 = vld [vmem:[%s5226_s1 + $0xf4] ss:$8 sps:$4 sm:$0xff]   ;;  %v3320_v41 = vld [vmem:[%s5226_s1 + $0xf0] ss:$8 sps:$4 sm:$0xff]   ;;  %v3336_v56 = vld [vmem:[%s5226_s1 + $0x164] ss:$8 sps:$4 sm:$0xff]  }
  0x2c   : > { %846 = vmatpush1.bf16.msra.mxu0 %v3260_v33  ;;  %v354_v33 = vshll.u32 %v3759_v49, 16  ;;  %v3325_v40 = vld [vmem:[%s5226_s1 + $0x174] ss:$8 sps:$4 sm:$0xff]   ;;  %v3915_v49 = vld [vmem:[%s3710_s7 + $0x50] ss:$0 sps:$4 sm:$0x11]  }
  0x2d   : > { %959 = vmatpush1.bf16.msra.mxu1 %v3261_v36  ;;  %847 = vmatprep.subr.bf16.mxu0 %v3262_v38  ;;  %v3317_v36 = vld [vmem:[%s5226_s1 + $0x200] ss:$8 sps:$4 sm:$0xff]   ;;  %v469_v38 = vrot.slane %v3878_v28, 1  ;;  %v373_v57 = vshll.u32 %v3831_v11, 16  ;;  %v371_v6 = vshrl.u32 %v3831_v11, 16 }
  0x2e   : > { %1297 = vmatprep.subr.bf16.mxu1 %v3268_v42  ;;  %v352_v42 = vor.u32 %v351_v32, %v347_v31  ;;  %v356_v43 = vrot.slane %v354_v33, 1  ;;  %v3952_v7 = vld [vmem:[%s3710_s7 + $0x5c] ss:$0 sps:$4 sm:$0x11]   ;;  %v3971_v18 = vld [vmem:[%s3710_s7] sm:$0xff]  }
  0x2f   : > { %v3358_v19 = vld [vmem:[%s5226_s1 + $0x144] ss:$8 sps:$4 sm:$0xff]   ;;  %v3993_v31 = vld [vmem:[%s3710_s7 + $0x8] ss:$0 sps:$4 sm:$0x11]   ;;  %v325_v32 = vshll.u32 %v3971_v18, 16 }
  0x30   : > { %977 = vmatmul.mubr.bf16.vlgmr.msra.gmra.mxu1 %v3753_v47  ;;  %848 = vmatpush2.bf16.msra.mxu0 %v3269_v46  ;;  %v3912_v46 = vsel %vm452_vm1, %v468_v37, %v469_v38  ;;  %v3342_v33 = vld [vmem:[%s5226_s1 + $0xb0] ss:$8 sps:$4 sm:$0xff]   ;;  %v4007_v37 = vld [vmem:[%s3710_s7 + $0x68] ss:$0 sps:$4 sm:$0x11]   ;;  %v390_v38 = vshll.u32 %v3878_v28, 16 }
  0x31   : > { %1298 = vmatpush1.bf16.msra.mxu1 %v3266_v44  ;;  %849 = vmatprep.subr.bf16.mxu0 %v3270_v51  ;;  %v3323_v44 = vld [vmem:[%s5226_s1 + $0x170] ss:$8 sps:$4 sm:$0xff]   ;;  %v359_v51 = vshrl.u32 %v3800_v63, 16  ;;  %v3348_v28 = vld [vmem:[%s5226_s1 + $0xa0] ss:$8 sps:$4 sm:$0xff]  }
  0x32   : > { %1299 = vmatprep.subr.bf16.mxu1 %v3274_v52  ;;  %986 = vmatprep.mubr.bf16.mxu1 %v3570_v2  ;;  %v3328_v52 = vld [vmem:[%s5226_s1 + $0xe4] ss:$8 sps:$4 sm:$0xff]  }
  0x34   : > { %850 = vmatpush2.bf16.msra.mxu0 %v3275_v54  ;;  %v366_v54 = vshll.u32 %v3803_v0, 16  ;;  %v3333_v0 = vld [vmem:[%s5226_s1 + $0xd4] ss:$8 sps:$4 sm:$0xff]  }
  0x35   : > { %1300 = vmatpush1.bf16.msra.mxu1 %v3272_v53  ;;  %851 = vmatprep.subr.bf16.mxu0 %v3276_v55  ;;  %v363_v53 = vrot.slane %v361_v34, 1  ;;  %v3923_v55 = vsel %vm321_vm0, %v352_v42, %v356_v43  ;;  %v383_v34 = vshrl.u32 %v3872_v26, 16  ;;  %v323_v42 = vshrl.u32 %v3971_v18, 16 }
  0x36   : > { %1301 = vmatprep.subr.bf16.mxu1 %v3282_v58  ;;  %v3326_v58 = vld [vmem:[%s5226_s1 + $0xe0] ss:$8 sps:$4 sm:$0xff]   ;;  %v327_v43 = vrot.slane %v325_v32, 1 }
  0x38   : > { %987 = vmatmul.mubr.bf16.gmra.mxu1 %v3797_v62  ;;  %852 = vmatpush2.bf16.msra.mxu0 %v3283_v60  ;;  %v472_v60 = vrot.slane %v3915_v49, 1 }
  0x39   : > { %1302 = vmatpush1.bf16.msra.mxu1 %v3280_v59  ;;  %853 = vmatprep.subr.bf16.mxu0 %v3284_v61  ;;  %v471_v59 = vrot.slane %v3909_v45, 1  ;;  %v3334_v61 = vld [vmem:[%s5226_s1 + $0x160] ss:$8 sps:$4 sm:$0xff]  }
  0x3a   : > { %1303 = vmatprep.subr.bf16.mxu1 %v3288_v1  ;;  %996 = vmatprep.mubr.bf16.mxu1 %v3570_v2  ;;  %v364_v1 = vor.u32 %v363_v53, %v359_v51  ;;  %v3366_v51 = vld [vmem:[%s5226_s1 + $0x134] ss:$8 sps:$4 sm:$0xff]  }
  0x3c   : > { %854 = vmatpush2.bf16.msra.mxu0 %v3289_v4  ;;  %v3347_v4 = vld [vmem:[%s5226_s1 + $0x154] ss:$8 sps:$4 sm:$0xff]  }
  0x3d   : > { %1304 = vmatpush1.bf16.msra.mxu1 %v3286_v3  ;;  %855 = vmatprep.subr.bf16.mxu0 %v3290_v5  ;;  %v368_v3 = vrot.slane %v366_v54, 1  ;;  %v3331_v5 = vld [vmem:[%s5226_s1 + $0xd0] ss:$8 sps:$4 sm:$0xff]   ;;  %v478_v54 = vrot.slane %v4007_v37, 1 }
  0x3e   : > { %1305 = vmatprep.subr.bf16.mxu1 %v3296_v8  ;;  %v375_v8 = vrot.slane %v373_v57, 1  ;;  %v3355_v57 = vld [vmem:[%s5226_s1 + $0x94] ss:$8 sps:$4 sm:$0xff]  }
  0x40   : > { %997 = vmatmul.mubr.bf16.gmra.mxu1 %v3834_v12  ;;  %856 = vmatpush2.bf16.msra.mxu0 %v3297_v10  ;;  %v3958_v10 = vld [vmem:[%s3710_s7 + $0x54] sm:$0xff]  }
  0x41   : > { %1306 = vmatpush1.bf16.msra.mxu1 %v3294_v9  ;;  %857 = vmatprep.subr.bf16.mxu0 %v3298_v14  ;;  %v3955_v9 = vsel %vm452_vm1, %v471_v59, %v472_v60  ;;  %v378_v14 = vshll.u32 %v3837_v13, 16  ;;  %v3337_v13 = vld [vmem:[%s5226_s1 + $0xc0] ss:$8 sps:$4 sm:$0xff]   ;;  %v392_v59 = vrot.slane %v390_v38, 1  ;;  %v397_v60 = vshll.u32 %v3909_v45, 16 }
  0x42   : > { %1307 = vmatprep.subr.bf16.mxu1 %v3302_v15  ;;  %1006 = vmatprep.mubr.bf16.mxu1 %v3570_v2  ;;  %v3339_v15 = vld [vmem:[%s5226_s1 + $0xc4] ss:$8 sps:$4 sm:$0xff]  }
  0x43   : > { %v380_v24 = vrot.slane %v378_v14, 1  ;;  %v402_v14 = vshll.u32 %v3915_v49, 16  ;;  %v3369_v49 = vld [vmem:[%s5226_s1 + $0x4f4] ss:$8 sps:$4 sm:$0xff]   ;;  %v3393_v38 = vld [vmem:[%s5226_s1 + $0x104] ss:$8 sps:$4 sm:$0xff]  }
  0x44   : > { %858 = vmatpush2.bf16.msra.mxu0 %v3303_v17  ;;  %v3345_v17 = vld [vmem:[%s5226_s1 + $0x150] ss:$8 sps:$4 sm:$0xff]  }
  0x45   : > { %1308 = vmatpush1.bf16.msra.mxu1 %v3300_v16  ;;  %859 = vmatprep.subr.bf16.mxu0 %v3304_v20  ;;  %v3965_v16 = vsel %vm321_vm0, %v364_v1, %v368_v3  ;;  %v474_v20 = vrot.slane %v3958_v10, 1  ;;  %v3353_v3 = vld [vmem:[%s5226_s1 + $0x90] ss:$8 sps:$4 sm:$0xff]  }
  0x46   : > { %1309 = vmatprep.subr.bf16.mxu1 %v3310_v21  ;;  %v475_v21 = vrot.slane %v3952_v7, 1 }
  0x48   : > { %1007 = vmatmul.mubr.bf16.gmra.mxu1 %v3875_v27  ;;  %860 = vmatpush2.bf16.msra.mxu0 %v3311_v23  ;;  %v376_v23 = vor.u32 %v375_v8, %v371_v6  ;;  %v399_v8 = vrot.slane %v397_v60, 1 }
  0x49   : > { %1310 = vmatpush1.bf16.msra.mxu1 %v3308_v22  ;;  %861 = vmatprep.subr.bf16.mxu0 %v3312_v25  ;;  %v3344_v22 = vld [vmem:[%s5226_s1 + $0xb4] ss:$8 sps:$4 sm:$0xff]   ;;  %v3356_v25 = vld [vmem:[%s5226_s1 + $0x140] ss:$8 sps:$4 sm:$0xff]  }
  0x4a   : > { %1311 = vmatprep.subr.bf16.mxu1 %v3316_v30  ;;  %1016 = vmatprep.mubr.bf16.mxu1 %v3570_v2  ;;  %v385_v30 = vshll.u32 %v3872_v26, 16 }
  0x4c   : > { %862 = vmatpush2.bf16.msra.mxu0 %v3317_v36  ;;  %v4004_v36 = vld [vmem:[%s3710_s7 + $0x60] sm:$0xff]  }
  0x4d   : > { %1312 = vmatpush1.bf16.msra.mxu1 %v3314_v35  ;;  %1410 = vmatprep.subr.bf16.mxu0 %v3325_v40  ;;  %v4001_v35 = vsel %vm452_vm1, %v474_v20, %v475_v21  ;;  %v4014_v40 = vsel %vm321_vm0, %v376_v23, %v380_v24  ;;  %v477_v53 = vrot.slane %v4004_v36, 1  ;;  %v404_v21 = vrot.slane %v402_v14, 1  ;;  %v3382_v23 = vld [vmem:[%s5226_s1 + $0x110] ss:$8 sps:$4 sm:$0xff]  }
  0x4e   : > { %1313 = vmatprep.subr.bf16.mxu1 %v3322_v39  ;;  %v3350_v39 = vld [vmem:[%s5226_s1 + $0xa4] ss:$8 sps:$4 sm:$0xff]   ;;  %v3367_v24 = vld [vmem:[%s5226_s1 + $0x4f0] ss:$8 sps:$4 sm:$0xff]   ;;  %v453_v14 = vrot.slane %v3971_v18, 1 }
  0x4f   : > { %864 = vmatmul.mubr.bf16.vlgmr.msra.gmra.mxu0 %v3722_v29  ;;  %v4041_v1 = vsel %vm452_vm1, %v477_v53, %v478_v54  ;;  %v3381_v53 = vld [vmem:[%s5226_s1 + $0x4c4] ss:$8 sps:$4 sm:$0xff]  }
  0x50   : > { %1017 = vmatmul.mubr.bf16.gmra.mxu1 %v3912_v46  ;;  %1411 = vmatpush1.bf16.msra.mxu0 %v3323_v44  ;;  %v330_v44 = vshll.u32 %v3993_v31, 16 }
  0x51   : > { %1314 = vmatpush2.bf16.msra.mxu1 %v3320_v41  ;;  %873 = vmatprep.mubr.bf16.mxu0 %v3923_v55  ;;  %v387_v41 = vrot.slane %v385_v30, 1  ;;  %v3372_v30 = vld [vmem:[%s5226_s1 + $0x4e4] ss:$8 sps:$4 sm:$0xff]  }
  0x52   : > { %1315 = vmatprep.subr.bf16.mxu1 %v3328_v52  ;;  %1026 = vmatprep.mubr.bf16.mxu1 %v3570_v2  ;;  %v3364_v52 = vld [vmem:[%s5226_s1 + $0x130] ss:$8 sps:$4 sm:$0xff]  }
  0x53   : > { %1412 = vmatprep.subr.bf16.mxu0 %v3336_v56  ;;  %v3375_v56 = vld [vmem:[%s5226_s1 + $0x124] ss:$8 sps:$4 sm:$0xff]  }
  0x54   : > { %1413 = vmatpush1.bf16.msra.mxu0 %v3334_v61  ;;  %v328_v61 = vor.u32 %v327_v43, %v323_v42  ;;  %v3378_v42 = vld [vmem:[%s5226_s1 + $0x4d4] ss:$8 sps:$4 sm:$0xff]  }
  0x55   : > { %1316 = vmatpush2.bf16.msra.mxu1 %v3326_v58  ;;  %1414 = vmatprep.subr.bf16.mxu0 %v3347_v4  ;;  %v388_v58 = vor.u32 %v387_v41, %v383_v34  ;;  %v395_v4 = vshrl.u32 %v3909_v45, 16  ;;  %v414_v34 = vshll.u32 %v3952_v7, 16  ;;  %v3370_v41 = vld [vmem:[%s5226_s1 + $0x4e0] ss:$8 sps:$4 sm:$0xff]   ;;  %v3405_v7 = vld [vmem:[%s5226_s1 + $0x5f4] ss:$8 sps:$4 sm:$0xff]  }
  0x56   : > { %1317 = vmatprep.subr.bf16.mxu1 %v3333_v0  ;;  %v332_v0 = vrot.slane %v330_v44, 1 }
  0x57   : > { %874 = vmatmul.mubr.bf16.gmra.mxu0 %v3756_v48  ;;  %v4051_v6 = vsel %vm321_vm0, %v388_v58, %v392_v59  ;;  %v400_v20 = vor.u32 %v399_v8, %v395_v4  ;;  %v416_v44 = vrot.slane %v414_v34, 1  ;;  %v3379_v58 = vld [vmem:[%s5226_s1 + $0x4c0] ss:$8 sps:$4 sm:$0xff]   ;;  %v3387_v59 = vld [vmem:[%s5226_s1 + $0x4b4] ss:$8 sps:$4 sm:$0xff]  }
  0x58   : > { %1027 = vmatmul.mubr.bf16.gmra.mxu1 %v3955_v9  ;;  %883 = vmatprep.mubr.bf16.mxu0 %v3965_v16  ;;  %v3396_v4 = vld [vmem:[%s5226_s1 + $0x494] ss:$8 sps:$4 sm:$0xff]   ;;  %v3397_v8 = vld [vmem:[%s5226_s1 + $0x480] ss:$8 sps:$4 sm:$0xff]  }
  0x59   : > { %1318 = vmatpush2.bf16.msra.mxu1 %v3331_v5  ;;  %1036 = vmatprep.mubr.bf16.mxu1 %v3570_v2  ;;  %v3361_v5 = vld [vmem:[%s5226_s1 + $0x84] ss:$8 sps:$4 sm:$0xff]   ;;  %v4082_v32 = vsel %vm321_vm0, %v400_v20, %v404_v21  ;;  %v3411_v20 = vld [vmem:[%s5226_s1 + $0x554] ss:$8 sps:$4 sm:$0xff]   ;;  %v3412_v21 = vld [vmem:[%s5226_s1 + $0x5e0] ss:$8 sps:$4 sm:$0xff]  }
  0x5a   : > { %1319 = vmatprep.subr.bf16.mxu1 %v3339_v15  ;;  %1415 = vmatpush1.bf16.msra.mxu0 %v3345_v17  ;;  %v333_v15 = vsel %vm321_vm0, %v328_v61, %v332_v0  ;;  %v3373_v17 = vld [vmem:[%s5226_s1 + $0x120] ss:$8 sps:$4 sm:$0xff]   ;;  %v3390_v61 = vld [vmem:[%s5226_s1 + $0x4a4] ss:$8 sps:$4 sm:$0xff]   ;;  %v3420_v34 = vld [vmem:[%s5226_s1 + $0x534] ss:$8 sps:$4 sm:$0xff]  }
  0x5b   : > { %1416 = vmatprep.subr.bf16.mxu0 %v3358_v19  ;;  %v3359_v19 = vld [vmem:[%s5226_s1 + $0x80] ss:$8 sps:$4 sm:$0xff]  }
  0x5d   : > { %1320 = vmatpush2.bf16.msra.mxu1 %v3337_v13  ;;  %v3384_v13 = vld [vmem:[%s5226_s1 + $0x114] ss:$8 sps:$4 sm:$0xff]  }
  0x5e   : > { %1321 = vmatprep.subr.bf16.mxu1 %v3344_v22  ;;  %1417 = vmatpush1.bf16.msra.mxu0 %v3356_v25  ;;  %v409_v22 = vshll.u32 %v3958_v10, 16  ;;  %v407_v25 = vshrl.u32 %v3958_v10, 16 }
  0x5f   : > { %884 = vmatmul.mubr.bf16.gmra.mxu0 %v3800_v63  ;;  %1418 = vmatprep.subr.bf16.mxu0 %v3366_v51  ;;  %v421_v51 = vshll.u32 %v4004_v36, 16 }
  0x60   : > { %1037 = vmatmul.mubr.bf16.gmra.mxu1 %v4001_v35  ;;  %893 = vmatprep.mubr.bf16.mxu0 %v4014_v40 }
  0x61   : > { %1322 = vmatpush2.bf16.msra.mxu1 %v3342_v33  ;;  %1046 = vmatprep.mubr.bf16.mxu1 %v3570_v2  ;;  %v411_v33 = vrot.slane %v409_v22, 1  ;;  %v3423_v22 = vld [vmem:[%s5226_s1 + $0x5d4] ss:$8 sps:$4 sm:$0xff]  }
  0x62   : > { %1323 = vmatprep.subr.bf16.mxu1 %v3350_v39  ;;  %1419 = vmatpush1.bf16.msra.mxu0 %v3364_v52  ;;  %v3391_v39 = vld [vmem:[%s5226_s1 + $0x100] ss:$8 sps:$4 sm:$0xff]   ;;  %v419_v52 = vshrl.u32 %v4004_v36, 16 }
  0x63   : > { %1420 = vmatprep.subr.bf16.mxu0 %v3375_v56  ;;  %v412_v43 = vor.u32 %v411_v33, %v407_v25  ;;  %v423_v56 = vrot.slane %v421_v51, 1  ;;  %v3421_v25 = vld [vmem:[%s5226_s1 + $0x5d0] ss:$8 sps:$4 sm:$0xff]   ;;  %v3415_v33 = vld [vmem:[%s5226_s1 + $0x540] ss:$8 sps:$4 sm:$0xff]  }
  0x64   : > { %v3429_v51 = vld [vmem:[%s5226_s1 + $0x514] ss:$8 sps:$4 sm:$0xff]  }
  0x65   : > { %1324 = vmatpush2.bf16.msra.mxu1 %v3348_v28  ;;  %v3376_v28 = vld [vmem:[%s5226_s1 + $0x4d0] ss:$8 sps:$4 sm:$0xff]   ;;  %v4113_v54 = vsel %vm321_vm0, %v412_v43, %v416_v44  ;;  %v424_v60 = vor.u32 %v423_v56, %v419_v52  ;;  %v3424_v43 = vld [vmem:[%s5226_s1 + $0x520] ss:$8 sps:$4 sm:$0xff]   ;;  %v3447_v44 = vld [vmem:[%s5226_s1 + $0x5a4] ss:$8 sps:$4 sm:$0xff]  }
  0x66   : > { %1325 = vmatprep.subr.bf16.mxu1 %v3355_v57  ;;  %1421 = vmatpush1.bf16.msra.mxu0 %v3373_v17  ;;  %v426_v57 = vshll.u32 %v4007_v37, 16  ;;  %v3402_v17 = vld [vmem:[%s5226_s1 + $0x574] ss:$8 sps:$4 sm:$0xff]   ;;  %v3435_v52 = vld [vmem:[%s5226_s1 + $0x504] ss:$8 sps:$4 sm:$0xff]  }
  0x67   : > { %894 = vmatmul.mubr.bf16.gmra.mxu0 %v3831_v11  ;;  %1422 = vmatprep.subr.bf16.mxu0 %v3384_v13  ;;  %v3400_v13 = vld [vmem:[%s5226_s1 + $0x570] ss:$8 sps:$4 sm:$0xff]   ;;  %v3456_v56 = vld [vmem:[%s5226_s1 + $0x594] ss:$8 sps:$4 sm:$0xff]  }
  0x68   : > { %1047 = vmatmul.mubr.bf16.gmra.mxu1 %v4041_v1  ;;  %903 = vmatprep.mubr.bf16.mxu0 %v4051_v6  ;;  %v428_v37 = vrot.slane %v426_v57, 1  ;;  %v3433_v57 = vld [vmem:[%s5226_s1 + $0x500] ss:$8 sps:$4 sm:$0xff]  }
  0x69   : > { %1326 = vmatpush2.bf16.msra.mxu1 %v3353_v3  ;;  %1329 = vmatprep.mubr.bf16.mxu1 %v333_v15  ;;  %v3388_v3 = vld [vmem:[%s5226_s1 + $0x4a0] ss:$8 sps:$4 sm:$0xff]   ;;  %v454_v15 = vrot.slane %v3993_v31, 1  ;;  %v3408_v31 = vld [vmem:[%s5226_s1 + $0x564] ss:$8 sps:$4 sm:$0xff]  }
  0x6a   : > { %1327 = vmatprep.subr.bf16.mxu1 %v3361_v5  ;;  %1423 = vmatpush1.bf16.msra.mxu0 %v3382_v23  ;;  %v4133_v0 = vsel %vm321_vm0, %v424_v60, %v428_v37  ;;  %v3394_v5 = vld [vmem:[%s5226_s1 + $0x490] ss:$8 sps:$4 sm:$0xff]   ;;  %v3444_v37 = vld [vmem:[%s5226_s1 + $0x364] ss:$8 sps:$4 sm:$0xff]  }
  0x6b   : > { %1424 = vmatprep.subr.bf16.mxu0 %v3393_v38  ;;  %v3409_v23 = vld [vmem:[%s5226_s1 + $0x550] ss:$8 sps:$4 sm:$0xff]   ;;  %v3430_v38 = vld [vmem:[%s5226_s1 + $0x5c0] ss:$8 sps:$4 sm:$0xff]  }
  0x6c   : > { %v3439_v60 = vld [vmem:[%s5226_s1 + $0x370] ss:$8 sps:$4 sm:$0xff]  }
  0x6d   : > { %1328 = vmatpush2.bf16.msra.mxu1 %v3359_v19  ;;  %v3414_v19 = vld [vmem:[%s5226_s1 + $0x5e4] ss:$8 sps:$4 sm:$0xff]  }
  0x6e   : > { %1904 = vmatprep.subr.bf16.mxu1 %v3369_v49  ;;  %1425 = vmatpush1.bf16.msra.mxu0 %v3391_v39  ;;  %v3406_v49 = vld [vmem:[%s5226_s1 + $0x560] ss:$8 sps:$4 sm:$0xff]   ;;  %v3418_v39 = vld [vmem:[%s5226_s1 + $0x530] ss:$8 sps:$4 sm:$0xff]  }
  0x6f   : > { %904 = vmatmul.mubr.bf16.gmra.mxu0 %v3872_v26  ;;  %2017 = vmatprep.subr.bf16.mxu0 %v3405_v7  ;;  %v3438_v7 = vld [vmem:[%s5226_s1 + $0x5b4] ss:$8 sps:$4 sm:$0xff]  }
  0x70   : > { %1330 = vmatmul.mubr.bf16.vlgmr.msra.gmra.mxu1 %v3971_v18  ;;  %913 = vmatprep.mubr.bf16.mxu0 %v4082_v32  ;;  %v3403_v18 = vld [vmem:[%s5226_s1 + $0x5f0] ss:$8 sps:$4 sm:$0xff]  }
  0x71   : > { %1905 = vmatpush1.bf16.msra.mxu1 %v3367_v24  ;;  %1339 = vmatprep.mubr.bf16.mxu1 %v3762_v50  ;;  %v3417_v24 = vld [vmem:[%s5226_s1 + $0x544] ss:$8 sps:$4 sm:$0xff]  }
  0x72   : > { %1906 = vmatprep.subr.bf16.mxu1 %v3372_v30  ;;  %v3432_v30 = vld [vmem:[%s5226_s1 + $0x5c4] ss:$8 sps:$4 sm:$0xff]  }
  0x75   : > { %1907 = vmatpush1.bf16.msra.mxu1 %v3370_v41  ;;  %v3426_v41 = vld [vmem:[%s5226_s1 + $0x524] ss:$8 sps:$4 sm:$0xff]  }
  0x76   : > { %1908 = vmatprep.subr.bf16.mxu1 %v3378_v42  ;;  %v3436_v42 = vld [vmem:[%s5226_s1 + $0x5b0] ss:$8 sps:$4 sm:$0xff]  }
  0x77   : > { %914 = vmatmul.mubr.bf16.gmra.mxu0 %v3909_v45 }
  0x78   : > { %1340 = vmatmul.mubr.bf16.gmra.mxu1 %v3722_v29  ;;  %923 = vmatprep.mubr.bf16.mxu0 %v4113_v54  ;;  %v3385_v29 = vld [vmem:[%s5226_s1 + $0x4b0] ss:$8 sps:$4 sm:$0xff]  }
  0x79   : > { %1909 = vmatpush1.bf16.msra.mxu1 %v3376_v28  ;;  %1349 = vmatprep.mubr.bf16.mxu1 %v3923_v55  ;;  %v3427_v28 = vld [vmem:[%s5226_s1 + $0x510] ss:$8 sps:$4 sm:$0xff]  }
  0x7a   : > { %1910 = vmatprep.subr.bf16.mxu1 %v3381_v53  ;;  %v3445_v53 = vld [vmem:[%s5226_s1 + $0x5a0] ss:$8 sps:$4 sm:$0xff]  }
  0x7d   : > { %1911 = vmatpush1.bf16.msra.mxu1 %v3379_v58  ;;  %v3441_v58 = vld [vmem:[%s5226_s1 + $0x374] ss:$8 sps:$4 sm:$0xff]  }
  0x7e   : > { %1912 = vmatprep.subr.bf16.mxu1 %v3387_v59  ;;  %v3454_v59 = vld [vmem:[%s5226_s1 + $0x590] ss:$8 sps:$4 sm:$0xff]  }
  0x7f   : > { %924 = vmatmul.mubr.bf16.gmra.mxu0 %v3958_v10 }
  0x80   : > { %1350 = vmatmul.mubr.bf16.gmra.mxu1 %v3756_v48  ;;  %933 = vmatprep.mubr.bf16.mxu0 %v4133_v0  ;;  %v3399_v48 = vld [vmem:[%s5226_s1 + $0x484] ss:$8 sps:$4 sm:$0xff]  }
  0x81   : > { %1913 = vmatpush1.bf16.msra.mxu1 %v3385_v29  ;;  %1359 = vmatprep.mubr.bf16.mxu1 %v3965_v16  ;;  %v3465_v29 = vld [vmem:[%s5226_s1 + $0x584] ss:$8 sps:$4 sm:$0xff]  }
  0x82   : > { %1914 = vmatprep.subr.bf16.mxu1 %v3390_v61  ;;  %v4277_v61 = vld [vmem:[%s3710_s7 + $0x18] sm:$0xff]  }
  0x85   : > { %1915 = vmatpush1.bf16.msra.mxu1 %v3388_v3  ;;  %v3463_v3 = vld [vmem:[%s5226_s1 + $0x580] ss:$8 sps:$4 sm:$0xff]  }
  0x86   : > { %1916 = vmatprep.subr.bf16.mxu1 %v3396_v4  ;;  %v3442_v4 = vld [vmem:[%s5226_s1 + $0x360] ss:$8 sps:$4 sm:$0xff]  }
  0x87   : > { %934 = vmatmul.mubr.bf16.gmra.mxu0 %v4004_v36 }
  0x88   : > { %1360 = vmatmul.mubr.bf16.gmra.mxu1 %v3800_v63  ;;  %1442 = vmatprep.mubr.bf16.mxu0 %v3570_v2  ;;  %v455_v63 = vsel %vm452_vm1, %v453_v14, %v454_v15  ;;  %v3453_v14 = vld [vmem:[%s5226_s1 + $0x344] ss:$8 sps:$4 sm:$0xff]  }
  0x89   : > { %1917 = vmatpush1.bf16.msra.mxu1 %v3394_v5  ;;  %1369 = vmatprep.mubr.bf16.mxu1 %v4014_v40  ;;  %v4290_v5 = vld [vmem:[%s5226_s1 + $0x474] ss:$8 sps:$4 sm:$0xff]   ;;  %v4305_v15 = vld [vmem:[%s3710_s7 + $0x24] sm:$0xff]  }
  0x8a   : > { %1918 = vmatprep.subr.bf16.mxu1 %v3399_v48  ;;  %v3450_v48 = vld [vmem:[%s5226_s1 + $0x354] ss:$8 sps:$4 sm:$0xff]  }
  0x8d   : > { %1919 = vmatpush1.bf16.msra.mxu1 %v3397_v8  ;;  %v3448_v8 = vld [vmem:[%s5226_s1 + $0x350] ss:$8 sps:$4 sm:$0xff]  }
  0x8e   : > { %1920 = vmatprep.subr.bf16.mxu1 %v3402_v17  ;;  %v3451_v17 = vld [vmem:[%s5226_s1 + $0x340] ss:$8 sps:$4 sm:$0xff]  }
  0x8f   : > { %1443 = vmatmul.mubr.bf16.vlgmr.msra.gmra.mxu0 %v455_v63  ;;  %v3459_v63 = vld [vmem:[%s5226_s1 + $0x334] ss:$8 sps:$4 sm:$0xff]  }
  0x90   : > { %1370 = vmatmul.mubr.bf16.gmra.mxu1 %v3831_v11  ;;  %2018 = vmatpush1.bf16.msra.mxu0 %v3403_v18  ;;  %v3462_v18 = vld [vmem:[%s5226_s1 + $0x324] ss:$8 sps:$4 sm:$0xff]  }
  0x91   : > { %1921 = vmatpush2.bf16.msra.mxu1 %v3400_v13  ;;  %1379 = vmatprep.mubr.bf16.mxu1 %v4051_v6  ;;  %v3457_v13 = vld [vmem:[%s5226_s1 + $0x330] ss:$8 sps:$4 sm:$0xff]  }
  0x92   : > { %1922 = vmatprep.subr.bf16.mxu1 %v3408_v31  ;;  %1452 = vmatprep.mubr.bf16.mxu0 %v3570_v2  ;;  %v3460_v31 = vld [vmem:[%s5226_s1 + $0x320] ss:$8 sps:$4 sm:$0xff]  }
  0x93   : > { %2019 = vmatprep.subr.bf16.mxu0 %v3414_v19  ;;  %v3468_v19 = vld [vmem:[%s5226_s1 + $0x314] ss:$8 sps:$4 sm:$0xff]  }
  0x94   : > { %2020 = vmatpush1.bf16.msra.mxu0 %v3412_v21  ;;  %v3474_v21 = vld [vmem:[%s5226_s1 + $0x3f4] ss:$8 sps:$4 sm:$0xff]  }
  0x95   : > { %1923 = vmatpush2.bf16.msra.mxu1 %v3406_v49  ;;  %2021 = vmatprep.subr.bf16.mxu0 %v3423_v22  ;;  %v3466_v49 = vld [vmem:[%s5226_s1 + $0x310] ss:$8 sps:$4 sm:$0xff]  }
  0x96   : > { %1924 = vmatprep.subr.bf16.mxu1 %v3411_v20  ;;  %v3469_v20 = vld [vmem:[%s5226_s1 + $0x300] ss:$8 sps:$4 sm:$0xff]   ;;  %v3472_v22 = vld [vmem:[%s5226_s1 + $0x3f0] ss:$8 sps:$4 sm:$0xff]  }
  0x97   : > { %1453 = vmatmul.mubr.bf16.gmra.mxu0 %v3753_v47 }
  0x98   : > { %1380 = vmatmul.mubr.bf16.gmra.mxu1 %v3872_v26  ;;  %1462 = vmatprep.mubr.bf16.mxu0 %v3570_v2 }
  0x99   : > { %1925 = vmatpush2.bf16.msra.mxu1 %v3409_v23  ;;  %1389 = vmatprep.mubr.bf16.mxu1 %v4082_v32  ;;  %v3480_v23 = vld [vmem:[%s5226_s1 + $0x3e4] ss:$8 sps:$4 sm:$0xff]  }
  0x9a   : > { %1926 = vmatprep.subr.bf16.mxu1 %v3417_v24  ;;  %2022 = vmatpush1.bf16.msra.mxu0 %v3421_v25  ;;  %v4360_v24 = vld [vmem:[%s3710_s7 + $0x6c] sm:$0xff]  }
  0x9b   : > { %2023 = vmatprep.subr.bf16.mxu0 %v3432_v30  ;;  %v4365_v25 = vld [vmem:[%s5226_s1 + $0x464] ss:$8 sps:$4 sm:$0xff]   ;;  %v3478_v30 = vld [vmem:[%s5226_s1 + $0x3e0] ss:$8 sps:$4 sm:$0xff]  }
  0x9d   : > { %1927 = vmatpush2.bf16.msra.mxu1 %v3415_v33  ;;  %v3483_v33 = vld [vmem:[%s5226_s1 + $0x3d4] ss:$8 sps:$4 sm:$0xff]  }
  0x9e   : > { %1928 = vmatprep.subr.bf16.mxu1 %v3420_v34  ;;  %2024 = vmatpush1.bf16.msra.mxu0 %v3430_v38  ;;  %v4379_v34 = vld [vmem:[%s5226_s1 + $0x460] ss:$8 sps:$4 sm:$0xff]   ;;  %v4388_v38 = vld [vmem:[%s3710_s7 + $0x74] ss:$0 sps:$4 sm:$0x11]  }
  0x9f   : > { %1463 = vmatmul.mubr.bf16.gmra.mxu0 %v3797_v62  ;;  %2025 = vmatprep.subr.bf16.mxu0 %v3438_v7  ;;  %v3489_v7 = vld [vmem:[%s5226_s1 + $0x3c4] ss:$8 sps:$4 sm:$0xff]  }
  0xa0   : > { %1390 = vmatmul.mubr.bf16.gmra.mxu1 %v3909_v45  ;;  %1472 = vmatprep.mubr.bf16.mxu0 %v3570_v2 }
  0xa1   : > { %1929 = vmatpush2.bf16.msra.mxu1 %v3418_v39  ;;  %1399 = vmatprep.mubr.bf16.mxu1 %v4113_v54  ;;  %v433_v39 = vshll.u32 %v4360_v24, 16 }
  0xa2   : > { %1930 = vmatprep.subr.bf16.mxu1 %v3426_v41  ;;  %2026 = vmatpush1.bf16.msra.mxu0 %v3436_v42  ;;  %v3481_v41 = vld [vmem:[%s5226_s1 + $0x3d0] ss:$8 sps:$4 sm:$0xff]   ;;  %v431_v42 = vshrl.u32 %v4360_v24, 16 }
  0xa3   : > { %2027 = vmatprep.subr.bf16.mxu0 %v3447_v44  ;;  %v438_v44 = vshll.u32 %v4388_v38, 16 }
  0xa5   : > { %1931 = vmatpush2.bf16.msra.mxu1 %v3424_v43  ;;  %v435_v43 = vrot.slane %v433_v39, 1 }
  0xa6   : > { %1932 = vmatprep.subr.bf16.mxu1 %v3429_v51  ;;  %2028 = vmatpush1.bf16.msra.mxu0 %v3445_v53  ;;  %v4406_v51 = vld [vmem:[%s5226_s1 + $0x450] ss:$8 sps:$4 sm:$0xff]  }
  0xa7   : > { %1473 = vmatmul.mubr.bf16.gmra.mxu0 %v3834_v12  ;;  %2029 = vmatprep.subr.bf16.mxu0 %v3456_v56  ;;  %v436_v53 = vor.u32 %v435_v43, %v431_v42  ;;  %v440_v56 = vrot.slane %v438_v44, 1 }
  0xa8   : > { %1400 = vmatmul.mubr.bf16.gmra.mxu1 %v3958_v10  ;;  %1482 = vmatprep.mubr.bf16.mxu0 %v3570_v2 }
  0xa9   : > { %1933 = vmatpush2.bf16.msra.mxu1 %v3427_v28  ;;  %1936 = vmatprep.mubr.bf16.mxu1 %v3923_v55  ;;  %v4413_v28 = vld [vmem:[%s5226_s1 + $0x444] ss:$8 sps:$4 sm:$0xff]  }
  0xaa   : > { %1934 = vmatprep.subr.bf16.mxu1 %v3435_v52  ;;  %2030 = vmatpush1.bf16.msra.mxu0 %v3454_v59  ;;  %v3487_v52 = vld [vmem:[%s5226_s1 + $0x3c0] ss:$8 sps:$4 sm:$0xff]   ;;  %v3498_v59 = vld [vmem:[%s5226_s1 + $0x3a4] ss:$8 sps:$4 sm:$0xff]  }
  0xab   : > { %2031 = vmatprep.subr.bf16.mxu0 %v3465_v29  ;;  %v4446_v29 = vld [vmem:[%s5226_s1 + $0x430] ss:$8 sps:$4 sm:$0xff]  }
  0xad   : > { %1935 = vmatpush2.bf16.msra.mxu1 %v3433_v57  ;;  %v4427_v57 = vld [vmem:[%s5226_s1 + $0x440] ss:$8 sps:$4 sm:$0xff]  }
  0xae   : > { %2370 = vmatprep.subr.bf16.mxu1 %v3441_v58  ;;  %2032 = vmatpush1.bf16.msra.mxu0 %v3463_v3  ;;  %v3490_v58 = vld [vmem:[%s5226_s1 + $0x3b0] ss:$8 sps:$4 sm:$0xff]   ;;  %v3496_v3 = vld [vmem:[%s5226_s1 + $0x3a0] ss:$8 sps:$4 sm:$0xff]  }
  0xaf   : > { %1483 = vmatmul.mubr.bf16.gmra.mxu0 %v3875_v27  ;;  %2483 = vmatprep.subr.bf16.mxu0 %v4290_v5 }
  0xb0   : > { %1937 = vmatmul.mubr.bf16.vlgmr.msra.gmra.mxu1 %v4277_v61  ;;  %1492 = vmatprep.mubr.bf16.mxu0 %v3570_v2 }
  0xb1   : > { %2371 = vmatpush1.bf16.msra.mxu1 %v3439_v60  ;;  %1946 = vmatprep.mubr.bf16.mxu1 %v3965_v16  ;;  %v441_v60 = vsel %vm321_vm0, %v436_v53, %v440_v56 }
  0xb2   : > { %2372 = vmatprep.subr.bf16.mxu1 %v3444_v37  ;;  %v3512_v37 = vld [vmem:[%s5226_s1 + $0x434] ss:$8 sps:$4 sm:$0xff]  }
  0xb5   : > { %2373 = vmatpush1.bf16.msra.mxu1 %v3442_v4  ;;  %v4454_v4 = vld [vmem:[%s5226_s1 + $0x424] ss:$8 sps:$4 sm:$0xff]  }
  0xb6   : > { %2374 = vmatprep.subr.bf16.mxu1 %v3450_v48  ;;  %v3501_v48 = vld [vmem:[%s5226_s1 + $0x390] ss:$8 sps:$4 sm:$0xff]  }
  0xb7   : > { %1493 = vmatmul.mubr.bf16.gmra.mxu0 %v3912_v46 }
  0xb8   : > { %1947 = vmatmul.mubr.bf16.gmra.mxu1 %v4305_v15  ;;  %1502 = vmatprep.mubr.bf16.mxu0 %v3570_v2 }
  0xb9   : > { %2375 = vmatpush1.bf16.msra.mxu1 %v3448_v8  ;;  %1956 = vmatprep.mubr.bf16.mxu1 %v4014_v40  ;;  %v3509_v8 = vld [vmem:[%s5226_s1 + $0x384] ss:$8 sps:$4 sm:$0xff]  }
  0xba   : > { %2376 = vmatprep.subr.bf16.mxu1 %v3453_v14  ;;  %v3513_v14 = vld [vmem:[%s5226_s1 + $0x420] ss:$8 sps:$4 sm:$0xff]  }
  0xbd   : > { %2377 = vmatpush1.bf16.msra.mxu1 %v3451_v17  ;;  %v3518_v17 = vld [vmem:[%s5226_s1 + $0x414] ss:$8 sps:$4 sm:$0xff]  }
  0xbe   : > { %2378 = vmatprep.subr.bf16.mxu1 %v3459_v63  ;;  %v3507_v63 = vld [vmem:[%s5226_s1 + $0x380] ss:$8 sps:$4 sm:$0xff]  }
  0xbf   : > { %1503 = vmatmul.mubr.bf16.gmra.mxu0 %v3955_v9 }
  0xc0   : > { %1957 = vmatmul.mubr.bf16.gmra.mxu1 %v3831_v11  ;;  %1512 = vmatprep.mubr.bf16.mxu0 %v3570_v2  ;;  %v3471_v11 = vld [vmem:[%s5226_s1 + $0x304] ss:$8 sps:$4 sm:$0xff]  }
  0xc1   : > { %2379 = vmatpush1.bf16.msra.mxu1 %v3457_v13  ;;  %1966 = vmatprep.mubr.bf16.mxu1 %v4051_v6  ;;  %v3516_v13 = vld [vmem:[%s5226_s1 + $0x410] ss:$8 sps:$4 sm:$0xff]  }
  0xc2   : > { %2380 = vmatprep.subr.bf16.mxu1 %v3462_v18  ;;  %v3521_v18 = vld [vmem:[%s5226_s1 + $0x404] ss:$8 sps:$4 sm:$0xff]  }
  0xc5   : > { %2381 = vmatpush1.bf16.msra.mxu1 %v3460_v31 }
  0xc6   : > { %2382 = vmatprep.subr.bf16.mxu1 %v3468_v19  ;;  %v3524_v19 = vld [vmem:[%s3710_s7 + $0xc] sm:$0xff]  }
  0xc7   : > { %1513 = vmatmul.mubr.bf16.gmra.mxu0 %v4001_v35 }
  0xc8   : > { %1967 = vmatmul.mubr.bf16.gmra.mxu1 %v3872_v26  ;;  %2049 = vmatprep.mubr.bf16.mxu0 %v3570_v2  ;;  %v4354_v26 = vld [vmem:[%s5226_s1 + $0x470] ss:$8 sps:$4 sm:$0xff]  }
  0xc9   : > { %2383 = vmatpush1.bf16.msra.mxu1 %v3466_v49  ;;  %1976 = vmatprep.mubr.bf16.mxu1 %v4082_v32 }
  0xca   : > { %2384 = vmatprep.subr.bf16.mxu1 %v3471_v11 }
  0xcd   : > { %2385 = vmatpush1.bf16.msra.mxu1 %v3469_v20 }
  0xce   : > { %2386 = vmatprep.subr.bf16.mxu1 %v3474_v21 }
  0xcf   : > { %2050 = vmatmul.mubr.bf16.vlgmr.msra.gmra.mxu0 %v3797_v62 }
  0xd0   : > { %1977 = vmatmul.mubr.bf16.gmra.mxu1 %v3909_v45  ;;  %2484 = vmatpush1.bf16.msra.mxu0 %v4354_v26  ;;  %v4385_v45 = vld [vmem:[%s5226_s1 + $0x454] ss:$8 sps:$4 sm:$0xff]  }
  0xd1   : > { %2387 = vmatpush2.bf16.msra.mxu1 %v3472_v22  ;;  %1986 = vmatprep.mubr.bf16.mxu1 %v4113_v54 }
  0xd2   : > { %2388 = vmatprep.subr.bf16.mxu1 %v3480_v23  ;;  %2059 = vmatprep.mubr.bf16.mxu0 %v3570_v2 }
  0xd3   : > { %2485 = vmatprep.subr.bf16.mxu0 %v4365_v25 }
  0xd4   : > { %2486 = vmatpush1.bf16.msra.mxu0 %v4379_v34 }
  0xd5   : > { %2389 = vmatpush2.bf16.msra.mxu1 %v3478_v30  ;;  %2487 = vmatprep.subr.bf16.mxu0 %v4385_v45 }
  0xd6   : > { %2390 = vmatprep.subr.bf16.mxu1 %v3483_v33 }
  0xd7   : > { %2060 = vmatmul.mubr.bf16.gmra.mxu0 %v3834_v12 }
  0xd8   : > { %1987 = vmatmul.mubr.bf16.gmra.mxu1 %v3958_v10  ;;  %2069 = vmatprep.mubr.bf16.mxu0 %v3570_v2  ;;  %v3492_v10 = vld [vmem:[%s5226_s1 + $0x3b4] ss:$8 sps:$4 sm:$0xff]  }
  0xd9   : > { %2391 = vmatpush2.bf16.msra.mxu1 %v3481_v41  ;;  %1996 = vmatprep.mubr.bf16.mxu1 %v4133_v0  ;;  %v3526_v41 = vld [vmem:[%s3710_s7 + $0x3c] sm:$0xff]  }
  0xda   : > { %2392 = vmatprep.subr.bf16.mxu1 %v3489_v7  ;;  %2488 = vmatpush1.bf16.msra.mxu0 %v4406_v51 }
  0xdb   : > { %2489 = vmatprep.subr.bf16.mxu0 %v4413_v28 }
  0xdd   : > { %2393 = vmatpush2.bf16.msra.mxu1 %v3487_v52 }
  0xde   : > { %2394 = vmatprep.subr.bf16.mxu1 %v3492_v10  ;;  %2490 = vmatpush1.bf16.msra.mxu0 %v4427_v57 }
  0xdf   : > { %2070 = vmatmul.mubr.bf16.gmra.mxu0 %v3875_v27  ;;  %2491 = vmatprep.subr.bf16.mxu0 %v3512_v37 }
  0xe0   : > { %1997 = vmatmul.mubr.bf16.gmra.mxu1 %v4004_v36  ;;  %2079 = vmatprep.mubr.bf16.mxu0 %v3570_v2  ;;  %v3503_v36 = vld [vmem:[%s5226_s1 + $0x394] ss:$8 sps:$4 sm:$0xff]  }
  0xe1   : > { %2395 = vmatpush2.bf16.msra.mxu1 %v3490_v58  ;;  %2006 = vmatprep.mubr.bf16.mxu1 %v441_v60 }
  0xe2   : > { %2396 = vmatprep.subr.bf16.mxu1 %v3498_v59  ;;  %2492 = vmatpush1.bf16.msra.mxu0 %v4446_v29 }
  0xe3   : > { %2493 = vmatprep.subr.bf16.mxu0 %v4454_v4 }
  0xe5   : > { %2397 = vmatpush2.bf16.msra.mxu1 %v3496_v3 }
  0xe6   : > { %2398 = vmatprep.subr.bf16.mxu1 %v3503_v36  ;;  %2494 = vmatpush1.bf16.msra.mxu0 %v3513_v14 }
  0xe7   : > { %2080 = vmatmul.mubr.bf16.gmra.mxu0 %v3912_v46  ;;  %2495 = vmatprep.subr.bf16.mxu0 %v3518_v17 }
  0xe8   : > { %2007 = vmatmul.mubr.bf16.gmra.mxu1 %v4360_v24  ;;  %2089 = vmatprep.mubr.bf16.mxu0 %v3570_v2 }
  0xe9   : > { %2399 = vmatpush2.bf16.msra.mxu1 %v3501_v48  ;;  %2402 = vmatprep.mubr.bf16.mxu1 %v3762_v50  ;;  %v3519_v50 = vld [vmem:[%s5226_s1 + $0x400] ss:$8 sps:$4 sm:$0xff]  }
  0xea   : > { %2400 = vmatprep.subr.bf16.mxu1 %v3509_v8  ;;  %2496 = vmatpush1.bf16.msra.mxu0 %v3516_v13 }
  0xeb   : > { %2497 = vmatprep.subr.bf16.mxu0 %v3521_v18 }
  0xed   : > { %2401 = vmatpush2.bf16.msra.mxu1 %v3507_v63 }
  0xee   : > { %3156 = vmatprep.subr.bf16.mxu1 %v4290_v5  ;;  %2498 = vmatpush1.bf16.msra.mxu0 %v3519_v50 }
  0xef   : > { %2090 = vmatmul.mubr.bf16.gmra.mxu0 %v3955_v9 }
  0xf0   : > { %v4488_v31 = vpop.f32.mrf.mxu1  ;;  %2403 = vmatmul.mubr.bf16.vlgmr.msra.gmra.mxu1 %v3524_v19  ;;  %2099 = vmatprep.mubr.bf16.mxu0 %v3570_v2 }
  0xf1   : > { %3164 = vmatpush1.bf16.msra.mxu1 %v4354_v26  ;;  %2412 = vmatprep.mubr.bf16.mxu1 %v3923_v55 }
  0xf2   : > { %v4497_v5 = vpop.f32.mrf.mxu1  ;;  %3157 = vmatprep.subr.bf16.mxu1 %v4365_v25 }
  0xf4   : > { %v4501_v49 = vpop.f32.mrf.mxu1 }
  0xf5   : > { %3165 = vmatpush1.bf16.msra.mxu1 %v4379_v34 }
  0xf6   : > { %v4504_v11 = vpop.f32.mrf.mxu1  ;;  %3158 = vmatprep.subr.bf16.mxu1 %v4385_v45 }
  0xf7   : > { %2100 = vmatmul.mubr.bf16.gmra.mxu0 %v4001_v35 }
  0xf8   : > { %v4507_v20 = vpop.f32.mrf.mxu1  ;;  %2413 = vmatmul.mubr.bf16.gmra.mxu1 %v4277_v61  ;;  %2109 = vmatprep.mubr.bf16.mxu0 %v3570_v2  ;;  %v481_v61 = vrot.slane %v4388_v38, 1 }
  0xf9   : > { %2422 = vmatprep.mubr.bf16.mxu1 %v3965_v16  ;;  %3166 = vmatpush1.bf16.msra.mxu1 %v4406_v51  ;;  %v480_v16 = vrot.slane %v4360_v24, 1 }
  0xfa   : > { %v4513_v55 = vpop.f32.mrf.mxu1  ;;  %3159 = vmatprep.subr.bf16.mxu1 %v4413_v28 }
  0xfb   : > { %v482_v30 = vsel %vm452_vm1, %v480_v16, %v481_v61 }
  0xfc   : > { %v4517_v21 = vpop.f32.mrf.mxu1 }
  0xfd   : > { %3167 = vmatpush1.bf16.msra.mxu1 %v4427_v57 }
  0xfe   : > { %v4519_v22 = vpop.f32.mrf.mxu1  ;;  %3160 = vmatprep.subr.bf16.mxu1 %v3512_v37 }
  0xff   : > { %2110 = vmatmul.mubr.bf16.gmra.mxu0 %v4041_v1 }
 0x100   : > { %v4522_v26 = vpop.f32.mrf.mxu1  ;;  %2423 = vmatmul.mubr.bf16.gmra.mxu1 %v4305_v15  ;;  %2119 = vmatprep.mubr.bf16.mxu0 %v3570_v2  ;;  %v3525_v15 = vld [vmem:[%s3710_s7 + $0x30] sm:$0xff]  }
 0x101   : > { %2432 = vmatprep.mubr.bf16.mxu1 %v4014_v40  ;;  %3168 = vmatpush1.bf16.msra.mxu1 %v4446_v29 }
 0x102   : > { %v4530_v23 = vpop.f32.mrf.mxu1  ;;  %3161 = vmatprep.subr.bf16.mxu1 %v4454_v4 }
 0x104   : > { %v4534_v25 = vpop.f32.mrf.mxu1 }
 0x105   : > { %3169 = vmatpush1.bf16.msra.mxu1 %v3513_v14 }
 0x106   : > { %v4537_v33 = vpop.f32.mrf.mxu1  ;;  %3162 = vmatprep.subr.bf16.mxu1 %v3518_v17 }
 0x107   : > { %2120 = vmatmul.mubr.bf16.gmra.mxu0 %v482_v30 }
 0x108   : > { %v4539_v40 = vpop.f32.mrf.mxu1  ;;  %2433 = vmatmul.mubr.bf16.gmra.mxu1 %v3525_v15  ;;  %2515 = vmatprep.mubr.bf16.mxu0 %v3570_v2 }
 0x109   : > { %2442 = vmatprep.mubr.bf16.mxu1 %v4051_v6  ;;  %3170 = vmatpush1.bf16.msra.mxu1 %v3516_v13 }
 0x10a   : > { %v4544_v24 = vpop.f32.mrf.mxu1  ;;  %3163 = vmatprep.subr.bf16.mxu1 %v3521_v18 }
 0x10c   : > { %v4546_v34 = vpop.f32.mrf.mxu1 }
 0x10d   : > { %3171 = vmatpush1.bf16.msra.mxu1 %v3519_v50 }
 0x10e   : > { %v4548_v45 = vpop.f32.mrf.mxu1 }
 0x10f   : > { %v4550_v38 = vpop.f32.mrf.mxu0  ;;  %2516 = vmatmul.mubr.bf16.vlgmr.msra.gmra.mxu0 %v3753_v47 }
 0x110   : > { %v4552_v39 = vpop.f32.mrf.mxu1  ;;  %2443 = vmatmul.mubr.bf16.gmra.mxu1 %v3526_v41  ;;  %2525 = vmatprep.mubr.bf16.mxu0 %v3570_v2 }
 0x111   : > { %2452 = vmatprep.mubr.bf16.mxu1 %v4082_v32  ;;  %v4558_v6 = vpop.f32.mrf.mxu0  ;;  %v3527_v32 = vld [vmem:[%s3710_s7 + $0x48] sm:$0xff]  }
 0x112   : > { %v4560_v7 = vpop.f32.mrf.mxu1 }
 0x113   : > { %5229 = vst [vmem:[#allocation2_spill] sm:$0xff] %v4560_v7  ;;  %v4562_v42 = vpop.f32.mrf.mxu0 }
 0x114   : > { %v4564_v43 = vpop.f32.mrf.mxu1 }
 0x115   : > { %5230 = vst [vmem:[#allocation3_spill] sm:$0xff] %v4564_v43  ;;  %v4566_v44 = vpop.f32.mrf.mxu0 }
 0x116   : > { %v4568_v51 = vpop.f32.mrf.mxu1 }
 0x117   : > { %5231 = vst [vmem:[#allocation4_spill] sm:$0xff] %v4568_v51  ;;  %v4570_v28 = vpop.f32.mrf.mxu0  ;;  %2526 = vmatmul.mubr.bf16.gmra.mxu0 %v3797_v62 }
 0x118   : > { %v4572_v47 = vpop.f32.mrf.mxu1  ;;  %2453 = vmatmul.mubr.bf16.gmra.mxu1 %v3527_v32  ;;  %2535 = vmatprep.mubr.bf16.mxu0 %v3570_v2 }
 0x119   : > { %5232 = vst [vmem:[#allocation5_spill] sm:$0xff] %v4572_v47  ;;  %2462 = vmatprep.mubr.bf16.mxu1 %v4113_v54  ;;  %v4578_v52 = vpop.f32.mrf.mxu0  ;;  %v3528_v54 = vld [vmem:[%s3710_s7 + $0x54] sm:$0xff]  }
 0x11a   : > { %v4580_v10 = vpop.f32.mrf.mxu1 }
 0x11b   : > { %5233 = vst [vmem:[#allocation6_spill] sm:$0xff] %v4580_v10  ;;  %v4582_v53 = vpop.f32.mrf.mxu0 }
 0x11c   : > { %v4584_v56 = vpop.f32.mrf.mxu1 }
 0x11d   : > { %5234 = vst [vmem:[#allocation7_spill] sm:$0xff] %v4584_v56  ;;  %v4586_v57 = vpop.f32.mrf.mxu0 }
 0x11e   : > { %v4588_v58 = vpop.f32.mrf.mxu1 }
 0x11f   : > { %5235 = vst [vmem:[#allocation8_spill] sm:$0xff] %v4588_v58  ;;  %v4590_v59 = vpop.f32.mrf.mxu0  ;;  %2536 = vmatmul.mubr.bf16.gmra.mxu0 %v3834_v12  ;;  %v3529_v12 = vld [vmem:[%s3710_s7 + $0x60] sm:$0xff]   ;;  %s2790_s7 = sshll.u32 %s3552_s12, 4 }
 0x120   : > { %v4592_v62 = vpop.f32.mrf.mxu1  ;;  %2463 = vmatmul.mubr.bf16.gmra.mxu1 %v3528_v54  ;;  %2545 = vmatprep.mubr.bf16.mxu0 %v3570_v2  ;;  %p188_p6 = scmp.lt.s32.totalorder %s2790_s7, 31 }
 0x121   : > { %5236 = vst [vmem:[#allocation9_spill] sm:$0xff] %v4592_v62  ;;  %2472 = vmatprep.mubr.bf16.mxu1 %v4133_v0  ;;  %v4598_v60 = vpop.f32.mrf.mxu0 }
 0x122   : > { %v4600_v37 = vpop.f32.mrf.mxu1  ;;  %s5356_s7 = smov (!%p188_p6, %s2790_s7), 31 }
 0x123   : > { %5237 = vst [vmem:[#allocation10_spill] sm:$0xff] %v4600_v37  ;;  %v4602_v29 = vpop.f32.mrf.mxu0  ;;  %s2791_s12 = sshll.u32 %s5356_s7, 2 }
 0x124   : > { %v4604_v3 = vpop.f32.mrf.mxu1  ;;  %s192_s27 = sadd.s32 %s2792_s26, %s2791_s12 }
 0x125   : > { %5238 = vst [vmem:[#allocation11_spill] sm:$0xff] %v4604_v3  ;;  %v4606_v4 = vpop.f32.mrf.mxu0  ;;  %s2793_s13 = sshll.u32 %s192_s27, 3 }
 0x126   : > { %v4608_v36 = vpop.f32.mrf.mxu1  ;;  %s4712_s5 = scalar_lea.vmem %s5228_s3, %s2793_s13 }
 0x127   : > { %5239 = vst [vmem:[#allocation12_spill] sm:$0xff] %v4608_v36  ;;  %v4610_v48 = vpop.f32.mrf.mxu0  ;;  %2546 = vmatmul.mubr.bf16.gmra.mxu0 %v3875_v27  ;;  %v1524_v36 = vlaneseq }
 0x128   : > { %v4612_v8 = vpop.f32.mrf.mxu1  ;;  %2473 = vmatmul.mubr.bf16.gmra.mxu1 %v3529_v12  ;;  %2555 = vmatprep.mubr.bf16.mxu0 %v3570_v2 }
 0x129   : > { %5240 = vst [vmem:[#allocation13_spill] sm:$0xff] %v4612_v8  ;;  %2575 = vmatprep.mubr.bf16.mxu1 %v3570_v2  ;;  %v4618_v0 = vpop.f32.mrf.mxu0 }
 0x12a   : > { %v4620_v14 = vpop.f32.mrf.mxu1 }
 0x12b   : > { %5241 = vst [vmem:[#allocation14_spill] sm:$0xff] %v4620_v14  ;;  %v4622_v17 = vpop.f32.mrf.mxu0 }
 0x12c   : > { %v4624_v63 = vpop.f32.mrf.mxu1 }
 0x12d   : > { %5242 = vst [vmem:[#allocation15_spill] sm:$0xff] %v4624_v63  ;;  %v4626_v13 = vpop.f32.mrf.mxu0 }
 0x12e   : > { %v4628_v18 = vpop.f32.mrf.mxu1 }
 0x12f   : > { %5243 = vst [vmem:[#allocation16_spill] sm:$0xff] %v4628_v18  ;;  %v4630_v19 = vpop.f32.mrf.mxu0  ;;  %2556 = vmatmul.mubr.bf16.gmra.mxu0 %v3912_v46 }
 0x130   : > { %v1331_v50 = vpop.f32.mrf.mxu1  ;;  %2576 = vmatmul.mubr.bf16.vlgmr.msra.gmra.mxu1 %v4001_v35  ;;  %2565 = vmatprep.mubr.bf16.mxu0 %v3570_v2 }
 0x131   : > { %2585 = vmatprep.mubr.bf16.mxu1 %v3570_v2  ;;  %v4636_v27 = vpop.f32.mrf.mxu0 }
 0x132   : > { %v1333_v16 = vpop.f32.mrf.mxu1 }
 0x133   : > { %v4638_v61 = vpop.f32.mrf.mxu0 }
 0x134   : > { %5244 = vst [vmem:[#allocation17_spill] sm:$0xff] %v4638_v61  ;;  %v1335_v30 = vpop.f32.mrf.mxu1  ;;  %v983_v61 = vadd.f32 %v4501_v49, %v4562_v42 }
 0x135   : > { %v4640_v15 = vpop.f32.mrf.mxu0 }
 0x136   : > { %5245 = vst [vmem:[#allocation18_spill] sm:$0xff] %v4640_v15  ;;  %v1337_v41 = vpop.f32.mrf.mxu1 }
 0x137   : > { %v4642_v32 = vpop.f32.mrf.mxu0  ;;  %2566 = vmatmul.mubr.bf16.gmra.mxu0 %v3955_v9 }
 0x138   : > { %5246 = vst [vmem:[#allocation19_spill] sm:$0xff] %v4642_v32  ;;  %v4644_v54 = vpop.f32.mrf.mxu1  ;;  %2586 = vmatmul.mubr.bf16.gmra.mxu1 %v4041_v1 }
 0x139   : > { %v4648_v46 = vpop.f32.mrf.mxu0 }
 0x13a   : > { %5247 = vst [vmem:[#allocation20_spill] sm:$0xff] %v4648_v46  ;;  %v4650_v2 = vpop.f32.mrf.mxu1 }
 0x13b   : > { %v4652_v35 = vpop.f32.mrf.mxu0 }
 0x13c   : > { %5248 = vst [vmem:[#allocation21_spill] sm:$0xff] %v4652_v35  ;;  %v4654_v12 = vpop.f32.mrf.mxu1 }
 0x13d   : > { %v4657_v18 = vpop.f32.mrf.mxu0 }
 0x13e   : > { %5249 = vst [vmem:[#allocation22_spill] sm:$0xff] %v4657_v18  ;;  %v4659_v63 = vpop.f32.mrf.mxu1  ;;  %v1525_v18 = vshrl.u32 %v1524_v36, 7  ;;  %v493_v36 = vld [vmem:[%s5227_s2] sm:$0x3] }
 0x13f   : > { %v4661_v14 = vpop.f32.mrf.mxu0 }
 0x140   : > { %5250 = vst [vmem:[#allocation23_spill] sm:$0xff] %v4661_v14  ;;  %v4663_v8 = vpop.f32.mrf.mxu1  ;;  %v1526_v10 = vsub.s32 0, %v1525_v18 }
 0x141   : > { %v4665_v9 = vpop.f32.mrf.mxu0 }
 0x142   : > { %5251 = vst [vmem:[#allocation24_spill] sm:$0xff] %v4665_v9  ;;  %v4667_v1 = vpop.f32.mrf.mxu1 }
 0x143   : > { %v4669_v3 = vpop.f32.mrf.mxu0 }
 0x144   : > { %5252 = vst [vmem:[#allocation25_spill] sm:$0xff] %v4669_v3  ;;  %v4671_v37 = vpop.f32.mrf.mxu1 }
 0x145   : > { %v4673_v62 = vpop.f32.mrf.mxu0 }
 0x146   : > { %5253 = vst [vmem:[#allocation26_spill] sm:$0xff] %v4673_v62  ;;  %v4675_v58 = vpop.f32.mrf.mxu1  ;;  %v1530_v62 = vsub.s32 1, %v1525_v18 }
 0x147   : > { %v4677_v56 = vpop.f32.mrf.mxu0 }
 0x148   : > { %5254 = vst [vmem:[#allocation27_spill] sm:$0xff] %v4677_v56  ;;  %v4679_v14 = vpop.f32.mrf.mxu1  ;;  %v979_v56 = vadd.f32 %v4488_v31, %v4550_v38  ;;  %v4707_v38 = vrot.slane %v493_v36, %v1530_v62  ;;  %v989_v62 = vadd.f32 %v4507_v20, %v4570_v28 }
 0x149   : > { %v4682_v9 = vpop.f32.mrf.mxu0 }
 0x14a   : > { %5255 = vst [vmem:[#allocation28_spill] sm:$0xff] %v4682_v9  ;;  %v4684_v35 = vpop.f32.mrf.mxu1  ;;  %v981_v9 = vadd.f32 %v4497_v5, %v4558_v6  ;;  %v1332_v51 = vadd.f32 %v1331_v50, %v979_v56  ;;  %v1336_v56 = vadd.f32 %v1335_v30, %v983_v61  ;;  %v993_v30 = vadd.f32 %v4517_v21, %v4582_v53 }
 0x14b   : > { %v4686_v3 = vpop.f32.mrf.mxu0 }
 0x14c   : > { %5256 = vst [vmem:[#allocation29_spill] sm:$0xff] %v4686_v3  ;;  %v4688_v46 = vpop.f32.mrf.mxu1  ;;  %v4701_v3 = vrot.slane %v493_v36, %v1526_v10  ;;  %v1334_v7 = vadd.f32 %v1333_v16, %v981_v9  ;;  %v985_v10 = vadd.f32 %v4504_v11, %v4566_v44  ;;  %v991_v11 = vadd.f32 %v4513_v55, %v4578_v52 }
 0x14d   : > { %v4695_v47 = vpop.f32.mrf.mxu0 }
 0x14e   : > { %v4697_v32 = vpop.f32.mrf.mxu1  ;;  %v1338_v18 = vadd.f32 %v1337_v41, %v985_v10  ;;  %v1344_v41 = vadd.f32 %v4650_v2, %v991_v11  ;;  %v1346_v10 = vadd.f32 %v4654_v12, %v993_v30 }
 0x14f   : > { %v1444_v43 = vpop.f32.mrf.mxu0 }
 0x150   : > { %v4703_v15 = vpop.f32.mrf.mxu1  ;;  %v1445_v31 = vadd.f32 %v1444_v43, %v1332_v51 }
 0x151   : > { %v1446_v6 = vpop.f32.mrf.mxu0 }
 0x152   : > { %v4714_v5 = vpop.f32.mrf.mxu1  ;;  %v1534_v49 = vadd.f32 %v4701_v3, %v1445_v31  ;;  %v1447_v42 = vadd.f32 %v1446_v6, %v1334_v7  ;;  %v1342_v7 = vadd.f32 %v4644_v54, %v989_v62  ;;  %v995_v6 = vadd.f32 %v4519_v22, %v4586_v57 }
 0x153   : > { %v1448_v51 = vpop.f32.mrf.mxu0  ;;  %v1001_v62 = vadd.f32 %v4530_v23, %v4598_v60 }
 0x154   : > { %v4719_v43 = vpop.f32.mrf.mxu1  ;;  %2628 = vst [vmem:[%s4712_s5] sm:$0xff] %v1534_v49  ;;  %v1535_v50 = vadd.f32 %v4707_v38, %v1447_v42  ;;  %v1449_v16 = vadd.f32 %v1448_v51, %v1336_v56  ;;  %v999_v49 = vadd.f32 %v4522_v26, %v4590_v59  ;;  %v1348_v42 = vadd.f32 %v4659_v63, %v995_v6 }
 0x155   : > { %v1450_v36 = vpop.f32.mrf.mxu0  ;;  %v1013_v6 = vadd.f32 %v4546_v34, %v4622_v17 }
 0x156   : > { %v4725_v9 = vpop.f32.mrf.mxu1  ;;  %2629 = vst [vmem:[%s4712_s5 + $0x8] sm:$0xff] %v1535_v50  ;;  %v1536_v44 = vadd.f32 %v4701_v3, %v1449_v16  ;;  %v1451_v61 = vadd.f32 %v1450_v36, %v1338_v18  ;;  %v1352_v18 = vadd.f32 %v4663_v8, %v999_v49  ;;  %v1003_v16 = vadd.f32 %v4534_v25, %v4602_v29 }
 0x157   : > { %v1454_v28 = vpop.f32.mrf.mxu0  ;;  %v1354_v36 = vadd.f32 %v4667_v1, %v1001_v62 }
 0x158   : > { %v4732_v20 = vpop.f32.mrf.mxu1  ;;  %2630 = vst [vmem:[%s4712_s5 + $0x10] sm:$0xff] %v1536_v44  ;;  %v1537_v31 = vadd.f32 %v4707_v38, %v1451_v61  ;;  %v1455_v55 = vadd.f32 %v1454_v28, %v1342_v7  ;;  %v1005_v7 = vadd.f32 %v4537_v33, %v4606_v4  ;;  %v1356_v44 = vadd.f32 %v4671_v37, %v1003_v16 }
 0x159   : > { %v1456_v54 = vpop.f32.mrf.mxu0  ;;  %v1009_v28 = vadd.f32 %v4539_v40, %v4610_v48 }
 0x15a   : > { %v4739_v52 = vpop.f32.mrf.mxu1  ;;  %2631 = vst [vmem:[%s4712_s5 + $0x18] sm:$0xff] %v1537_v31  ;;  %v1538_v56 = vadd.f32 %v4701_v3, %v1455_v55  ;;  %v1457_v21 = vadd.f32 %v1456_v54, %v1344_v41  ;;  %v1358_v30 = vadd.f32 %v4675_v58, %v1005_v7  ;;  %v1011_v31 = vadd.f32 %v4544_v24, %v4618_v0  ;;  %v5261_v7 = vld [vmem:[#allocation4_spill] sm:$0xff] }
 0x15b   : > { %v1458_v2 = vpop.f32.mrf.mxu0  ;;  %v1362_v55 = vadd.f32 %v4679_v14, %v1009_v28 }
 0x15c   : > { %v4746_v53 = vpop.f32.mrf.mxu1  ;;  %2636 = vst [vmem:[%s4712_s5 + $0x40] sm:$0xff] %v1538_v56  ;;  %v1539_v51 = vadd.f32 %v4707_v38, %v1457_v21  ;;  %v1459_v22 = vadd.f32 %v1458_v2, %v1346_v10  ;;  %v1364_v10 = vadd.f32 %v4684_v35, %v1011_v31  ;;  %v1015_v21 = vadd.f32 %v4548_v45, %v4626_v13 }
 0x15d   : > { %v1460_v12 = vpop.f32.mrf.mxu0  ;;  %v1366_v2 = vadd.f32 %v4688_v46, %v1013_v6 }
 0x15e   : > { %v4753_v57 = vpop.f32.mrf.mxu1  ;;  %2637 = vst [vmem:[%s4712_s5 + $0x48] sm:$0xff] %v1539_v51  ;;  %v1540_v50 = vadd.f32 %v4701_v3, %v1459_v22  ;;  %v1461_v26 = vadd.f32 %v1460_v12, %v1348_v42  ;;  %v1019_v42 = vadd.f32 %v4552_v39, %v4630_v19  ;;  %v1368_v51 = vadd.f32 %v4697_v32, %v1015_v21  ;;  %v5257_v12 = vld [vmem:[#allocation2_spill] sm:$0xff]  ;;  %v5258_v32 = vld [vmem:[#allocation17_spill] sm:$0xff] }
 0x15f   : > { %v1464_v63 = vpop.f32.mrf.mxu0  ;;  %v1021_v62 = vadd.f32 %v5257_v12, %v4636_v27 }
 0x160   : > { %v4760_v59 = vpop.f32.mrf.mxu1  ;;  %2638 = vst [vmem:[%s4712_s5 + $0x50] sm:$0xff] %v1540_v50  ;;  %v1541_v11 = vadd.f32 %v4707_v38, %v1461_v26  ;;  %v1465_v23 = vadd.f32 %v1464_v63, %v1352_v18  ;;  %v1372_v18 = vadd.f32 %v4703_v15, %v1019_v42  ;;  %v5259_v63 = vld [vmem:[#allocation3_spill] sm:$0xff]  ;;  %v5260_v15 = vld [vmem:[#allocation18_spill] sm:$0xff] }
 0x161   : > { %v1466_v8 = vpop.f32.mrf.mxu0  ;;  %v1023_v16 = vadd.f32 %v5259_v63, %v5258_v32 }
 0x162   : > { %v4767_v60 = vpop.f32.mrf.mxu1  ;;  %2639 = vst [vmem:[%s4712_s5 + $0x58] sm:$0xff] %v1541_v11  ;;  %v1542_v61 = vadd.f32 %v4701_v3, %v1465_v23  ;;  %v1467_v25 = vadd.f32 %v1466_v8, %v1354_v36  ;;  %v1374_v36 = vadd.f32 %v4714_v5, %v1021_v62  ;;  %v5262_v5 = vld [vmem:[#allocation19_spill] sm:$0xff] }
 0x163   : > { %v1468_v1 = vpop.f32.mrf.mxu0 }
 0x164   : > { %v4774_v29 = vpop.f32.mrf.mxu1  ;;  %2644 = vst [vmem:[%s4712_s5 + $0x80] sm:$0xff] %v1542_v61  ;;  %v1543_v41 = vadd.f32 %v4707_v38, %v1467_v25  ;;  %v1469_v33 = vadd.f32 %v1468_v1, %v1356_v44  ;;  %v1025_v44 = vadd.f32 %v5261_v7, %v5260_v15  ;;  %v1376_v61 = vadd.f32 %v4719_v43, %v1023_v16  ;;  %v5264_v43 = vld [vmem:[#allocation20_spill] sm:$0xff] }
 0x165   : > { %v1470_v37 = vpop.f32.mrf.mxu0 }
 0x166   : > { %v4781_v4 = vpop.f32.mrf.mxu1  ;;  %2645 = vst [vmem:[%s4712_s5 + $0x88] sm:$0xff] %v1543_v41  ;;  %v1544_v54 = vadd.f32 %v4701_v3, %v1469_v33  ;;  %v1471_v40 = vadd.f32 %v1470_v37, %v1358_v30  ;;  %v5263_v41 = vld [vmem:[#allocation5_spill] sm:$0xff]  ;;  %v1378_v37 = vadd.f32 %v4725_v9, %v1025_v44 }
 0x167   : > { %v1474_v58 = vpop.f32.mrf.mxu0  ;;  %v1029_v33 = vadd.f32 %v5263_v41, %v5262_v5  ;;  %v5266_v9 = vld [vmem:[#allocation21_spill] sm:$0xff] }
 0x168   : > { %v4788_v48 = vpop.f32.mrf.mxu1  ;;  %2646 = vst [vmem:[%s4712_s5 + $0x90] sm:$0xff] %v1544_v54  ;;  %v1545_v56 = vadd.f32 %v4707_v38, %v1471_v40  ;;  %v1475_v24 = vadd.f32 %v1474_v58, %v1362_v55  ;;  %v5265_v58 = vld [vmem:[#allocation6_spill] sm:$0xff] }
 0x169   : > { %v1476_v14 = vpop.f32.mrf.mxu0  ;;  %v1031_v6 = vadd.f32 %v5265_v58, %v5264_v43 }
 0x16a   : > { %v4795_v0 = vpop.f32.mrf.mxu1  ;;  %2647 = vst [vmem:[%s4712_s5 + $0x98] sm:$0xff] %v1545_v56  ;;  %v1546_v49 = vadd.f32 %v4701_v3, %v1475_v24  ;;  %v1477_v34 = vadd.f32 %v1476_v14, %v1364_v10  ;;  %v1382_v10 = vadd.f32 %v4732_v20, %v1029_v33  ;;  %v5268_v20 = vld [vmem:[#allocation22_spill] sm:$0xff] }
 0x16b   : > { %v1478_v35 = vpop.f32.mrf.mxu0 }
 0x16c   : > { %v4802_v17 = vpop.f32.mrf.mxu1  ;;  %2652 = vst [vmem:[%s4712_s5 + $0xc0] sm:$0xff] %v1546_v49  ;;  %v1547_v22 = vadd.f32 %v4707_v38, %v1477_v34  ;;  %v1479_v45 = vadd.f32 %v1478_v35, %v1366_v2  ;;  %v5267_v2 = vld [vmem:[#allocation7_spill] sm:$0xff]  ;;  %v1384_v34 = vadd.f32 %v4739_v52, %v1031_v6 }
 0x16d   : > { %v1480_v46 = vpop.f32.mrf.mxu0  ;;  %v1033_v49 = vadd.f32 %v5267_v2, %v5266_v9  ;;  %v5270_v52 = vld [vmem:[#allocation23_spill] sm:$0xff] }
 0x16e   : > { %v4809_v13 = vpop.f32.mrf.mxu1  ;;  %2653 = vst [vmem:[%s4712_s5 + $0xc8] sm:$0xff] %v1547_v22  ;;  %v1548_v50 = vadd.f32 %v4701_v3, %v1479_v45  ;;  %v1481_v39 = vadd.f32 %v1480_v46, %v1368_v51  ;;  %v5269_v45 = vld [vmem:[#allocation8_spill] sm:$0xff] }
 0x16f   : > { %v1484_v19 = vpop.f32.mrf.mxu0  ;;  %v1035_v46 = vadd.f32 %v5269_v45, %v5268_v20  ;;  %v1386_v12 = vadd.f32 %v4746_v53, %v1033_v49  ;;  %v5272_v53 = vld [vmem:[#allocation24_spill] sm:$0xff] }
 0x170   : > { %v4816_v26 = vpop.f32.mrf.mxu1  ;;  %2654 = vst [vmem:[%s4712_s5 + $0xd0] sm:$0xff] %v1548_v50  ;;  %v1549_v11 = vadd.f32 %v4707_v38, %v1481_v39  ;;  %v1485_v27 = vadd.f32 %v1484_v19, %v1372_v18  ;;  %v5271_v19 = vld [vmem:[#allocation9_spill] sm:$0xff] }
 0x171   : > { %v1486_v23 = vpop.f32.mrf.mxu0  ;;  %v1039_v32 = vadd.f32 %v5271_v19, %v5270_v52  ;;  %v1388_v63 = vadd.f32 %v4753_v57, %v1035_v46  ;;  %v5274_v57 = vld [vmem:[#allocation25_spill] sm:$0xff] }
 0x172   : > { %v4823_v8 = vpop.f32.mrf.mxu1  ;;  %2655 = vst [vmem:[%s4712_s5 + $0xd8] sm:$0xff] %v1549_v11  ;;  %v1550_v25 = vadd.f32 %v4701_v3, %v1485_v27  ;;  %v1487_v1 = vadd.f32 %v1486_v23, %v1374_v36  ;;  %v5273_v23 = vld [vmem:[#allocation10_spill] sm:$0xff] }
 0x173   : > { %v1488_v28 = vpop.f32.mrf.mxu0  ;;  %v1041_v15 = vadd.f32 %v5273_v23, %v5272_v53  ;;  %v1392_v7 = vadd.f32 %v4760_v59, %v1039_v32  ;;  %v5276_v59 = vld [vmem:[#allocation26_spill] sm:$0xff] }
 0x174   : > { %v4830_v30 = vpop.f32.mrf.mxu1  ;;  %2660 = vst [vmem:[%s4712_s5 + $0x100] sm:$0xff] %v1550_v25  ;;  %v1551_v31 = vadd.f32 %v4707_v38, %v1487_v1  ;;  %v1489_v55 = vadd.f32 %v1488_v28, %v1376_v61  ;;  %v5275_v28 = vld [vmem:[#allocation11_spill] sm:$0xff] }
 0x175   : > { %v1490_v54 = vpop.f32.mrf.mxu0  ;;  %v1043_v5 = vadd.f32 %v5275_v28, %v5274_v57  ;;  %v1394_v41 = vadd.f32 %v4767_v60, %v1041_v15  ;;  %v5278_v60 = vld [vmem:[#allocation27_spill] sm:$0xff] }
 0x176   : > { %v4837_v40 = vpop.f32.mrf.mxu1  ;;  %2661 = vst [vmem:[%s4712_s5 + $0x108] sm:$0xff] %v1551_v31  ;;  %v1552_v56 = vadd.f32 %v4701_v3, %v1489_v55  ;;  %v1491_v24 = vadd.f32 %v1490_v54, %v1378_v37  ;;  %v5277_v54 = vld [vmem:[#allocation12_spill] sm:$0xff] }
 0x177   : > { %v1494_v14 = vpop.f32.mrf.mxu0  ;;  %v1045_v43 = vadd.f32 %v5277_v54, %v5276_v59  ;;  %v1396_v58 = vadd.f32 %v4774_v29, %v1043_v5  ;;  %v5280_v29 = vld [vmem:[#allocation28_spill] sm:$0xff] }
 0x178   : > { %v4844_v21 = vpop.f32.mrf.mxu1  ;;  %2662 = vst [vmem:[%s4712_s5 + $0x110] sm:$0xff] %v1552_v56  ;;  %v1553_v35 = vadd.f32 %v4707_v38, %v1491_v24  ;;  %v1495_v42 = vadd.f32 %v1494_v14, %v1382_v10  ;;  %v5279_v14 = vld [vmem:[#allocation13_spill] sm:$0xff] }
 0x179   : > { %v1496_v51 = vpop.f32.mrf.mxu0  ;;  %v1049_v9 = vadd.f32 %v5279_v14, %v5278_v60  ;;  %v1398_v2 = vadd.f32 %v4781_v4, %v1045_v43  ;;  %v5282_v4 = vld [vmem:[#allocation29_spill] sm:$0xff] }
 0x17a   : > { %v4851_v22 = vpop.f32.mrf.mxu1  ;;  %2663 = vst [vmem:[%s4712_s5 + $0x118] sm:$0xff] %v1553_v35  ;;  %v1554_v62 = vadd.f32 %v4701_v3, %v1495_v42  ;;  %v1497_v18 = vadd.f32 %v1496_v51, %v1384_v34  ;;  %v5281_v51 = vld [vmem:[#allocation14_spill] sm:$0xff] }
 0x17b   : > { %v1498_v50 = vpop.f32.mrf.mxu0  ;;  %v1051_v20 = vadd.f32 %v5281_v51, %v5280_v29  ;;  %v1402_v45 = vadd.f32 %v4788_v48, %v1049_v9 }
 0x17c   : > { %v4858_v39 = vpop.f32.mrf.mxu1  ;;  %2668 = vst [vmem:[%s4712_s5 + $0x140] sm:$0xff] %v1554_v62  ;;  %v1555_v16 = vadd.f32 %v4707_v38, %v1497_v18  ;;  %v1499_v36 = vadd.f32 %v1498_v50, %v1386_v12  ;;  %v5283_v50 = vld [vmem:[#allocation15_spill] sm:$0xff] }
 0x17d   : > { %v1500_v11 = vpop.f32.mrf.mxu0  ;;  %v1053_v52 = vadd.f32 %v5283_v50, %v5282_v4  ;;  %v1404_v19 = vadd.f32 %v4795_v0, %v1051_v20 }
 0x17e   : > { %v4865_v27 = vpop.f32.mrf.mxu1  ;;  %2669 = vst [vmem:[%s4712_s5 + $0x148] sm:$0xff] %v1555_v16  ;;  %v1556_v44 = vadd.f32 %v4701_v3, %v1499_v36  ;;  %v1501_v61 = vadd.f32 %v1500_v11, %v1388_v63  ;;  %v5284_v36 = vld [vmem:[#allocation16_spill] sm:$0xff] }
 0x17f   : > { %v1504_v25 = vpop.f32.mrf.mxu0  ;;  %v1055_v11 = vadd.f32 %v5284_v36, %v4695_v47  ;;  %v1406_v53 = vadd.f32 %v4802_v17, %v1053_v52 }
 0x180   : > { %v4872_v1 = vpop.f32.mrf.mxu1  ;;  %2670 = vst [vmem:[%s4712_s5 + $0x150] sm:$0xff] %v1556_v44  ;;  %v1557_v33 = vadd.f32 %v4707_v38, %v1501_v61  ;;  %v1505_v37 = vadd.f32 %v1504_v25, %v1392_v7 }
 0x181   : > { %v1506_v31 = vpop.f32.mrf.mxu0  ;;  %v1408_v44 = vadd.f32 %v4809_v13, %v1055_v11 }
 0x182   : > { %v4879_v55 = vpop.f32.mrf.mxu1  ;;  %2671 = vst [vmem:[%s4712_s5 + $0x158] sm:$0xff] %v1557_v33  ;;  %v1558_v6 = vadd.f32 %v4701_v3, %v1505_v37  ;;  %v1507_v10 = vadd.f32 %v1506_v31, %v1394_v41 }
 0x183   : > { %v1508_v56 = vpop.f32.mrf.mxu0 }
 0x184   : > { %v4886_v24 = vpop.f32.mrf.mxu1  ;;  %2676 = vst [vmem:[%s4712_s5 + $0x180] sm:$0xff] %v1558_v6  ;;  %v1559_v49 = vadd.f32 %v4707_v38, %v1507_v10  ;;  %v1509_v34 = vadd.f32 %v1508_v56, %v1396_v58 }
 0x185   : > { %v1510_v35 = vpop.f32.mrf.mxu0 }
 0x186   : > { %v4893_v42 = vpop.f32.mrf.mxu1  ;;  %2677 = vst [vmem:[%s4712_s5 + $0x188] sm:$0xff] %v1559_v49  ;;  %v1560_v46 = vadd.f32 %v4701_v3, %v1509_v34  ;;  %v1511_v12 = vadd.f32 %v1510_v35, %v1398_v2 }
 0x187   : > { %v1514_v62 = vpop.f32.mrf.mxu0 }
 0x188   : > { %v4900_v18 = vpop.f32.mrf.mxu1  ;;  %2678 = vst [vmem:[%s4712_s5 + $0x190] sm:$0xff] %v1560_v46  ;;  %v1561_v32 = vadd.f32 %v4707_v38, %v1511_v12  ;;  %v1515_v63 = vadd.f32 %v1514_v62, %v1402_v45 }
 0x189   : > { %v1516_v16 = vpop.f32.mrf.mxu0 }
 0x18a   : > { %v4907_v48 = vpop.f32.mrf.mxu1  ;;  %2679 = vst [vmem:[%s4712_s5 + $0x198] sm:$0xff] %v1561_v32  ;;  %v1562_v23 = vadd.f32 %v4701_v3, %v1515_v63  ;;  %v1517_v15 = vadd.f32 %v1516_v16, %v1404_v19 }
 0x18b   : > { %v1518_v7 = vpop.f32.mrf.mxu0 }
 0x18c   : > { %v4914_v0 = vpop.f32.mrf.mxu1  ;;  %2684 = vst [vmem:[%s4712_s5 + $0x1c0] sm:$0xff] %v1562_v23  ;;  %v1563_v61 = vadd.f32 %v4707_v38, %v1517_v15  ;;  %v1519_v25 = vadd.f32 %v1518_v7, %v1406_v53 }
 0x18d   : > { %v1520_v57 = vpop.f32.mrf.mxu0 }
 0x18e   : > { %v4919_v28 = vpop.f32.mrf.mxu1  ;;  %2685 = vst [vmem:[%s4712_s5 + $0x1c8] sm:$0xff] %v1563_v61  ;;  %v1564_v47 = vadd.f32 %v4701_v3, %v1519_v25  ;;  %v1521_v17 = vadd.f32 %v1520_v57, %v1408_v44 }
 0x18f   : > { %v4925_v41 = vpop.f32.mrf.mxu0 }
 0x190   : > { %v4923_v5 = vpop.f32.mrf.mxu1  ;;  %2686 = vst [vmem:[%s4712_s5 + $0x1d0] sm:$0xff] %v1564_v47  ;;  %v1565_v33 = vadd.f32 %v4707_v38, %v1521_v17 }
 0x191   : > { %v4931_v13 = vpop.f32.mrf.mxu0 }
 0x192   : > { %v4929_v37 = vpop.f32.mrf.mxu1  ;;  %2687 = vst [vmem:[%s4712_s5 + $0x1d8] sm:$0xff] %v1565_v33 }
 0x193   : > { %5285 = vst [vmem:[#allocation2_spill] sm:$0xff] %v4929_v37  ;;  %v4936_v59 = vpop.f32.mrf.mxu0 }
 0x194   : > { %v4934_v31 = vpop.f32.mrf.mxu1 }
 0x195   : > { %5286 = vst [vmem:[#allocation17_spill] sm:$0xff] %v4934_v31  ;;  %v4940_v43 = vpop.f32.mrf.mxu0 }
 0x196   : > { %v4938_v54 = vpop.f32.mrf.mxu1 }
 0x197   : > { %5287 = vst [vmem:[#allocation3_spill] sm:$0xff] %v4938_v54  ;;  %v4944_v6 = vpop.f32.mrf.mxu0 }
 0x198   : > { %v4942_v58 = vpop.f32.mrf.mxu1 }
 0x199   : > { %5288 = vst [vmem:[#allocation18_spill] sm:$0xff] %v4942_v58  ;;  %v4948_v56 = vpop.f32.mrf.mxu0 }
 0x19a   : > { %v4946_v10 = vpop.f32.mrf.mxu1 }
 0x19b   : > { %5289 = vst [vmem:[#allocation4_spill] sm:$0xff] %v4946_v10  ;;  %v4952_v14 = vpop.f32.mrf.mxu0 }
 0x19c   : > { %v4950_v60 = vpop.f32.mrf.mxu1 }
 0x19d   : > { %5290 = vst [vmem:[#allocation19_spill] sm:$0xff] %v4950_v60  ;;  %v4956_v2 = vpop.f32.mrf.mxu0 }
 0x19e   : > { %v4954_v9 = vpop.f32.mrf.mxu1 }
 0x19f   : > { %5291 = vst [vmem:[#allocation5_spill] sm:$0xff] %v4954_v9  ;;  %v4960_v34 = vpop.f32.mrf.mxu0 }
 0x1a0   : > { %v4958_v49 = vpop.f32.mrf.mxu1 }
 0x1a1   : > { %v4964_v29 = vpop.f32.mrf.mxu0 }
 0x1a2   : > { %v4962_v35 = vpop.f32.mrf.mxu1 }
 0x1a3   : > { %5292 = vst [vmem:[#allocation20_spill] sm:$0xff] %v4962_v35  ;;  %v4968_v20 = vpop.f32.mrf.mxu0 }
 0x1a4   : > { %v4966_v51 = vpop.f32.mrf.mxu1 }
 0x1a5   : > { %5293 = vst [vmem:[#allocation6_spill] sm:$0xff] %v4966_v51  ;;  %v4972_v46 = vpop.f32.mrf.mxu0 }
 0x1a6   : > { %v4970_v45 = vpop.f32.mrf.mxu1 }
 0x1a7   : > { %5294 = vst [vmem:[#allocation21_spill] sm:$0xff] %v4970_v45  ;;  %v4976_v62 = vpop.f32.mrf.mxu0 }
 0x1a8   : > { %v4974_v12 = vpop.f32.mrf.mxu1 }
 0x1a9   : > { %5295 = vst [vmem:[#allocation7_spill] sm:$0xff] %v4974_v12  ;;  %v4980_v50 = vpop.f32.mrf.mxu0 }
 0x1aa   : > { %v4978_v4 = vpop.f32.mrf.mxu1 }
 0x1ab   : > { %5296 = vst [vmem:[#allocation22_spill] sm:$0xff] %v4978_v4  ;;  %v4984_v19 = vpop.f32.mrf.mxu0 }
 0x1ac   : > { %v4982_v52 = vpop.f32.mrf.mxu1 }
 0x1ad   : > { %5297 = vst [vmem:[#allocation8_spill] sm:$0xff] %v4982_v52  ;;  %v4988_v63 = vpop.f32.mrf.mxu0 }
 0x1ae   : > { %v4986_v32 = vpop.f32.mrf.mxu1 }
 0x1af   : > { %5298 = vst [vmem:[#allocation23_spill] sm:$0xff] %v4986_v32  ;;  %v4990_v16 = vpop.f32.mrf.mxu0 }
 0x1b0   : > { %v2404_v36 = vpop.f32.mrf.mxu1 }
 0x1b1   : > { %v4992_v11 = vpop.f32.mrf.mxu0 }
 0x1b2   : > { %5299 = vst [vmem:[#allocation9_spill] sm:$0xff] %v4992_v11  ;;  %v2406_v53 = vpop.f32.mrf.mxu1 }
 0x1b3   : > { %v4994_v23 = vpop.f32.mrf.mxu0 }
 0x1b4   : > { %5300 = vst [vmem:[#allocation24_spill] sm:$0xff] %v4994_v23  ;;  %v2408_v15 = vpop.f32.mrf.mxu1 }
 0x1b5   : > { %v4996_v7 = vpop.f32.mrf.mxu0 }
 0x1b6   : > { %5301 = vst [vmem:[#allocation10_spill] sm:$0xff] %v4996_v7  ;;  %v2410_v44 = vpop.f32.mrf.mxu1 }
 0x1b7   : > { %v4998_v61 = vpop.f32.mrf.mxu0 }
 0x1b8   : > { %5302 = vst [vmem:[#allocation25_spill] sm:$0xff] %v4998_v61  ;;  %v2414_v25 = vpop.f32.mrf.mxu1 }
 0x1b9   : > { %v5000_v57 = vpop.f32.mrf.mxu0 }
 0x1ba   : > { %5303 = vst [vmem:[#allocation11_spill] sm:$0xff] %v5000_v57  ;;  %v2416_v47 = vpop.f32.mrf.mxu1 }
 0x1bb   : > { %v5002_v17 = vpop.f32.mrf.mxu0 }
 0x1bc   : > { %5304 = vst [vmem:[#allocation26_spill] sm:$0xff] %v5002_v17  ;;  %v2418_v33 = vpop.f32.mrf.mxu1 }
 0x1bd   : > { %v5004_v32 = vpop.f32.mrf.mxu0 }
 0x1be   : > { %5305 = vst [vmem:[#allocation12_spill] sm:$0xff] %v5004_v32  ;;  %v2420_v9 = vpop.f32.mrf.mxu1 }
 0x1bf   : > { %v5006_v52 = vpop.f32.mrf.mxu0 }
 0x1c0   : > { %v5008_v60 = vpop.f32.mrf.mxu1 }
 0x1c1   : > { %v5010_v4 = vpop.f32.mrf.mxu0 }
 0x1c2   : > { %5306 = vst [vmem:[#allocation27_spill] sm:$0xff] %v5010_v4  ;;  %v5012_v10 = vpop.f32.mrf.mxu1 }
 0x1c3   : > { %v5014_v12 = vpop.f32.mrf.mxu0 }
 0x1c4   : > { %5307 = vst [vmem:[#allocation13_spill] sm:$0xff] %v5014_v12  ;;  %v5016_v61 = vpop.f32.mrf.mxu1  ;;  %v2052_v12 = vadd.f32 %v4925_v41, %v4816_v26  ;;  %v2058_v41 = vadd.f32 %v4940_v43, %v4837_v40  ;;  %v2064_v40 = vadd.f32 %v4948_v56, %v4851_v22  ;;  %v2068_v56 = vadd.f32 %v4956_v2, %v4865_v27 }
 0x1c5   : > { %v5018_v57 = vpop.f32.mrf.mxu0  ;;  %v2074_v2 = vadd.f32 %v4964_v29, %v4879_v55 }
 0x1c6   : > { %5308 = vst [vmem:[#allocation28_spill] sm:$0xff] %v5018_v57  ;;  %v5020_v58 = vpop.f32.mrf.mxu1  ;;  %v2405_v31 = vadd.f32 %v2404_v36, %v2052_v12 }
 0x1c7   : > { %v5022_v17 = vpop.f32.mrf.mxu0 }
 0x1c8   : > { %5309 = vst [vmem:[#allocation14_spill] sm:$0xff] %v5022_v17  ;;  %v5024_v32 = vpop.f32.mrf.mxu1  ;;  %v2054_v17 = vadd.f32 %v4931_v13, %v4823_v8 }
 0x1c9   : > { %v5026_v45 = vpop.f32.mrf.mxu0 }
 0x1ca   : > { %5310 = vst [vmem:[#allocation29_spill] sm:$0xff] %v5026_v45  ;;  %v5028_v7 = vpop.f32.mrf.mxu1  ;;  %v2407_v35 = vadd.f32 %v2406_v53, %v2054_v17 }
 0x1cb   : > { %v5030_v54 = vpop.f32.mrf.mxu0 }
 0x1cc   : > { %5311 = vst [vmem:[#allocation15_spill] sm:$0xff] %v5030_v54  ;;  %v5032_v51 = vpop.f32.mrf.mxu1  ;;  %v2056_v54 = vadd.f32 %v4936_v59, %v4830_v30  ;;  %v2411_v30 = vadd.f32 %v2410_v44, %v2058_v41 }
 0x1cd   : > { %v5036_v23 = vpop.f32.mrf.mxu0 }
 0x1ce   : > { %5312 = vst [vmem:[#allocation16_spill] sm:$0xff] %v5036_v23  ;;  %v5038_v57 = vpop.f32.mrf.mxu1  ;;  %v2409_v23 = vadd.f32 %v2408_v15, %v2056_v54 }
 0x1cf   : > { %v2517_v45 = vpop.f32.mrf.mxu0 }
 0x1d0   : > { %v5042_v4 = vpop.f32.mrf.mxu1  ;;  %v2518_v11 = vadd.f32 %v2517_v45, %v2405_v31 }
 0x1d1   : > { %5313 = vst [vmem:[#allocation30_spill] sm:$0xff] %v5042_v4  ;;  %v2519_v26 = vpop.f32.mrf.mxu0  ;;  %v2062_v4 = vadd.f32 %v4944_v6, %v4844_v21  ;;  %v2066_v6 = vadd.f32 %v4952_v14, %v4858_v39  ;;  %v2072_v14 = vadd.f32 %v4960_v34, %v4872_v1 }
 0x1d2   : > { %v5046_v37 = vpop.f32.mrf.mxu1  ;;  %v2596_v8 = vadd.f32 %v2518_v11, %v4701_v3  ;;  %v2520_v13 = vadd.f32 %v2519_v26, %v2407_v35 }
 0x1d3   : > { %v2521_v36 = vpop.f32.mrf.mxu0  ;;  %v2415_v54 = vadd.f32 %v2414_v25, %v2062_v4  ;;  %v2419_v4 = vadd.f32 %v2418_v33, %v2066_v6  ;;  %v2425_v33 = vadd.f32 %v5008_v60, %v2072_v14  ;;  %v2078_v60 = vadd.f32 %v4972_v46, %v4893_v42 }
 0x1d4   : > { %v5051_v12 = vpop.f32.mrf.mxu1  ;;  %2632 = vst [vmem:[%s4712_s5 + $0x20] sm:$0xff] %v2596_v8  ;;  %v2597_v31 = vadd.f32 %v2520_v13, %v4707_v38  ;;  %v2522_v59 = vadd.f32 %v2521_v36, %v2409_v23  ;;  %v2417_v23 = vadd.f32 %v2416_v47, %v2064_v40  ;;  %v2421_v47 = vadd.f32 %v2420_v9, %v2068_v56 }
 0x1d5   : > { %v2523_v53 = vpop.f32.mrf.mxu0  ;;  %v2076_v9 = vadd.f32 %v4968_v20, %v4886_v24 }
 0x1d6   : > { %v5057_v45 = vpop.f32.mrf.mxu1  ;;  %2633 = vst [vmem:[%s4712_s5 + $0x28] sm:$0xff] %v2597_v31  ;;  %v2598_v43 = vadd.f32 %v2522_v59, %v4701_v3  ;;  %v2524_v35 = vadd.f32 %v2523_v53, %v2411_v30  ;;  %v2427_v59 = vadd.f32 %v5012_v10, %v2074_v2  ;;  %v2082_v10 = vadd.f32 %v4976_v62, %v4900_v18  ;;  %v5316_v2 = vld [vmem:[#allocation20_spill] sm:$0xff] }
 0x1d7   : > { %v2527_v21 = vpop.f32.mrf.mxu0 }
 0x1d8   : > { %v5063_v11 = vpop.f32.mrf.mxu1  ;;  %2634 = vst [vmem:[%s4712_s5 + $0x30] sm:$0xff] %v2598_v43  ;;  %v2599_v15 = vadd.f32 %v2524_v35, %v4707_v38  ;;  %v2528_v44 = vadd.f32 %v2527_v21, %v2415_v54  ;;  %v2429_v54 = vadd.f32 %v5016_v61, %v2076_v9  ;;  %v2431_v21 = vadd.f32 %v5020_v58, %v2078_v60 }
 0x1d9   : > { %v2529_v22 = vpop.f32.mrf.mxu0  ;;  %v2084_v61 = vadd.f32 %v4980_v50, %v4907_v48  ;;  %v2086_v58 = vadd.f32 %v4984_v19, %v4914_v0  ;;  %v2092_v19 = vadd.f32 %v4990_v16, %v4923_v5 }
 0x1da   : > { %v5069_v17 = vpop.f32.mrf.mxu1  ;;  %2635 = vst [vmem:[%s4712_s5 + $0x38] sm:$0xff] %v2599_v15  ;;  %v2600_v25 = vadd.f32 %v2528_v44, %v4701_v3  ;;  %v2530_v26 = vadd.f32 %v2529_v22, %v2417_v23  ;;  %v2435_v15 = vadd.f32 %v5024_v32, %v2082_v10 }
 0x1db   : > { %v2531_v39 = vpop.f32.mrf.mxu0  ;;  %v2437_v56 = vadd.f32 %v5028_v7, %v2084_v61  ;;  %v5325_v61 = vld [vmem:[#allocation21_spill] sm:$0xff] }
 0x1dc   : > { %v5075_v41 = vpop.f32.mrf.mxu1  ;;  %2640 = vst [vmem:[%s4712_s5 + $0x60] sm:$0xff] %v2600_v25  ;;  %v2601_v8 = vadd.f32 %v2530_v26, %v4707_v38  ;;  %v2532_v13 = vadd.f32 %v2531_v39, %v2419_v4  ;;  %v2088_v25 = vadd.f32 %v4988_v63, %v4919_v28  ;;  %v2439_v26 = vadd.f32 %v5032_v51, %v2086_v58  ;;  %v5314_v63 = vld [vmem:[#allocation2_spill] sm:$0xff] }
 0x1dd   : > { %v2533_v27 = vpop.f32.mrf.mxu0 }
 0x1de   : > { %v5081_v36 = vpop.f32.mrf.mxu1  ;;  %2641 = vst [vmem:[%s4712_s5 + $0x68] sm:$0xff] %v2601_v8  ;;  %v2602_v30 = vadd.f32 %v2532_v13, %v4701_v3  ;;  %v2534_v31 = vadd.f32 %v2533_v27, %v2421_v47  ;;  %v2112_v47 = vadd.f32 %v5006_v52, %v4958_v49  ;;  %v2441_v8 = vadd.f32 %v5038_v57, %v2088_v25  ;;  %v5315_v13 = vld [vmem:[#allocation9_spill] sm:$0xff] }
 0x1df   : > { %v2537_v34 = vpop.f32.mrf.mxu0  ;;  %v2094_v27 = vadd.f32 %v5315_v13, %v5314_v63  ;;  %v5319_v57 = vld [vmem:[#allocation17_spill] sm:$0xff]  ;;  %v5331_v13 = vld [vmem:[#allocation4_spill] sm:$0xff] }
 0x1e0   : > { %v2464_v1 = vpop.f32.mrf.mxu1  ;;  %2642 = vst [vmem:[%s4712_s5 + $0x70] sm:$0xff] %v2602_v30  ;;  %v2603_v53 = vadd.f32 %v2534_v31, %v4707_v38  ;;  %v2538_v40 = vadd.f32 %v2537_v34, %v2425_v33  ;;  %v5317_v33 = vld [vmem:[#allocation27_spill] sm:$0xff]  ;;  %v5318_v31 = vld [vmem:[#allocation30_spill] sm:$0xff]  ;;  %v5328_v25 = vld [vmem:[#allocation25_spill] sm:$0xff] }
 0x1e1   : > { %v2539_v29 = vpop.f32.mrf.mxu0  ;;  %v2114_v30 = vadd.f32 %v5317_v33, %v5316_v2  ;;  %v2445_v34 = vadd.f32 %v5318_v31, %v2092_v19  ;;  %v2465_v9 = vadd.f32 %v2464_v1, %v2112_v47  ;;  %v5333_v33 = vld [vmem:[#allocation22_spill] sm:$0xff] }
 0x1e2   : > { %v2466_v55 = vpop.f32.mrf.mxu1  ;;  %2643 = vst [vmem:[%s4712_s5 + $0x78] sm:$0xff] %v2603_v53  ;;  %v2604_v43 = vadd.f32 %v2538_v40, %v4701_v3  ;;  %v2540_v35 = vadd.f32 %v2539_v29, %v2427_v59  ;;  %v5320_v59 = vld [vmem:[#allocation24_spill] sm:$0xff]  ;;  %v5321_v40 = vld [vmem:[#allocation6_spill] sm:$0xff]  ;;  %v5322_v29 = vld [vmem:[#allocation13_spill] sm:$0xff] }
 0x1e3   : > { %v2541_v20 = vpop.f32.mrf.mxu0  ;;  %v2096_v53 = vadd.f32 %v5320_v59, %v5319_v57  ;;  %v2116_v60 = vadd.f32 %v5322_v29, %v5321_v40  ;;  %v5335_v59 = vld [vmem:[#allocation19_spill] sm:$0xff]  ;;  %v5337_v29 = vld [vmem:[#allocation8_spill] sm:$0xff] }
 0x1e4   : > { %v2468_v24 = vpop.f32.mrf.mxu1  ;;  %2648 = vst [vmem:[%s4712_s5 + $0xa0] sm:$0xff] %v2604_v43  ;;  %v2605_v6 = vadd.f32 %v2540_v35, %v4707_v38  ;;  %v2542_v23 = vadd.f32 %v2541_v20, %v2429_v54  ;;  %v2447_v54 = vadd.f32 %v5046_v37, %v2094_v27  ;;  %v2467_v20 = vadd.f32 %v2466_v55, %v2114_v30  ;;  %v5332_v27 = vld [vmem:[#allocation11_spill] sm:$0xff]  ;;  %v5334_v30 = vld [vmem:[#allocation29_spill] sm:$0xff] }
 0x1e5   : > { %v2543_v46 = vpop.f32.mrf.mxu0  ;;  %v2104_v2 = vadd.f32 %v5332_v27, %v5331_v13 }
 0x1e6   : > { %v2470_v42 = vpop.f32.mrf.mxu1  ;;  %2649 = vst [vmem:[%s4712_s5 + $0xa8] sm:$0xff] %v2605_v6  ;;  %v2606_v44 = vadd.f32 %v2542_v23, %v4701_v3  ;;  %v2544_v22 = vadd.f32 %v2543_v46, %v2431_v21  ;;  %v5323_v6 = vld [vmem:[#allocation3_spill] sm:$0xff]  ;;  %v5324_v23 = vld [vmem:[#allocation10_spill] sm:$0xff] }
 0x1e7   : > { %v2547_v62 = vpop.f32.mrf.mxu0  ;;  %v2098_v46 = vadd.f32 %v5324_v23, %v5323_v6  ;;  %v5339_v6 = vld [vmem:[#allocation5_spill] sm:$0xff]  ;;  %v5340_v23 = vld [vmem:[#allocation12_spill] sm:$0xff] }
 0x1e8   : > { %v5108_v18 = vpop.f32.mrf.mxu1  ;;  %2650 = vst [vmem:[%s4712_s5 + $0xb0] sm:$0xff] %v2606_v44  ;;  %v2607_v4 = vadd.f32 %v2544_v22, %v4707_v38  ;;  %v2548_v48 = vadd.f32 %v2547_v62, %v2435_v15  ;;  %v5326_v15 = vld [vmem:[#allocation28_spill] sm:$0xff]  ;;  %v2449_v22 = vadd.f32 %v5051_v12, %v2096_v53  ;;  %v2469_v62 = vadd.f32 %v2468_v24, %v2116_v60  ;;  %v5336_v53 = vld [vmem:[#allocation26_spill] sm:$0xff]  ;;  %v5338_v60 = vld [vmem:[#allocation15_spill] sm:$0xff] }
 0x1e9   : > { %v2549_v32 = vpop.f32.mrf.mxu0  ;;  %v2118_v44 = vadd.f32 %v5326_v15, %v5325_v61  ;;  %v2106_v40 = vadd.f32 %v5336_v53, %v5335_v59  ;;  %v5341_v61 = vld [vmem:[#allocation23_spill] sm:$0xff]  ;;  %v5342_v15 = vld [vmem:[#allocation16_spill] sm:$0xff] }
 0x1ea   : > { %v5115_v50 = vpop.f32.mrf.mxu1  ;;  %2651 = vst [vmem:[%s4712_s5 + $0xb8] sm:$0xff] %v2607_v4  ;;  %v2608_v39 = vadd.f32 %v2548_v48, %v4701_v3  ;;  %v2550_v0 = vadd.f32 %v2549_v32, %v2437_v56  ;;  %v5327_v32 = vld [vmem:[#allocation18_spill] sm:$0xff] }
 0x1eb   : > { %v2551_v14 = vpop.f32.mrf.mxu0  ;;  %v2471_v12 = vadd.f32 %v2470_v42, %v2118_v44 }
 0x1ec   : > { %v5124_v7 = vpop.f32.mrf.mxu1  ;;  %2656 = vst [vmem:[%s4712_s5 + $0xe0] sm:$0xff] %v2608_v39  ;;  %v2609_v28 = vadd.f32 %v2550_v0, %v4707_v38  ;;  %v2552_v51 = vadd.f32 %v2551_v14, %v2439_v26  ;;  %v2102_v26 = vadd.f32 %v5328_v25, %v5327_v32  ;;  %v5329_v39 = vld [vmem:[#allocation7_spill] sm:$0xff]  ;;  %v5330_v0 = vld [vmem:[#allocation14_spill] sm:$0xff]  ;;  %v2451_v14 = vadd.f32 %v5057_v45, %v2098_v46 }
 0x1ed   : > { %v2553_v16 = vpop.f32.mrf.mxu0  ;;  %v2122_v19 = vadd.f32 %v5330_v0, %v5329_v39  ;;  %v2108_v46 = vadd.f32 %v5340_v23, %v5339_v6 }
 0x1ee   : > { %v5135_v5 = vpop.f32.mrf.mxu1  ;;  %2657 = vst [vmem:[%s4712_s5 + $0xe8] sm:$0xff] %v2609_v28  ;;  %v2610_v49 = vadd.f32 %v2552_v51, %v4701_v3  ;;  %v2554_v52 = vadd.f32 %v2553_v16, %v2441_v8  ;;  %v2124_v16 = vadd.f32 %v5334_v30, %v5333_v33  ;;  %v2455_v45 = vadd.f32 %v5063_v11, %v2102_v26 }
 0x1ef   : > { %v2557_v43 = vpop.f32.mrf.mxu0  ;;  %v2475_v42 = vadd.f32 %v5108_v18, %v2122_v19  ;;  %v2126_v11 = vadd.f32 %v5338_v60, %v5337_v29 }
 0x1f0   : > { %v2577_v35 = vpop.f32.mrf.mxu1  ;;  %2658 = vst [vmem:[%s4712_s5 + $0xf0] sm:$0xff] %v2610_v49  ;;  %v2611_v10 = vadd.f32 %v2554_v52, %v4707_v38  ;;  %v2558_v1 = vadd.f32 %v2557_v43, %v2445_v34  ;;  %v2477_v18 = vadd.f32 %v5115_v50, %v2124_v16  ;;  %v2459_v50 = vadd.f32 %v5075_v41, %v2106_v40 }
 0x1f1   : > { %v2578_v21 = vadd.f32 %v2577_v35, %v2465_v9  ;;  %v2559_v37 = vpop.f32.mrf.mxu0  ;;  %v2479_v44 = vadd.f32 %v5124_v7, %v2126_v11 }
 0x1f2   : > { %v2579_v58 = vpop.f32.mrf.mxu1  ;;  %2659 = vst [vmem:[%s4712_s5 + $0xf8] sm:$0xff] %v2611_v10  ;;  %v2612_v55 = vadd.f32 %v2558_v1, %v4701_v3  ;;  %v2560_v4 = vadd.f32 %v2559_v37, %v2447_v54  ;;  %v2457_v54 = vadd.f32 %v5069_v17, %v2104_v2  ;;  %v2128_v17 = vadd.f32 %v5342_v15, %v5341_v61 }
 0x1f3   : > { %v2620_v56 = vadd.f32 %v2578_v21, %v4701_v3  ;;  %v2580_v48 = vadd.f32 %v2579_v58, %v2467_v20  ;;  %v2561_v24 = vpop.f32.mrf.mxu0 }
 0x1f4   : > { %v2581_v47 = vpop.f32.mrf.mxu1  ;;  %2664 = vst [vmem:[%s4712_s5 + $0x120] sm:$0xff] %v2612_v55  ;;  %v2613_v8 = vadd.f32 %v2560_v4, %v4707_v38  ;;  %v2562_v51 = vadd.f32 %v2561_v24, %v2449_v22  ;;  %v2461_v4 = vadd.f32 %v5081_v36, %v2108_v46 }
 0x1f5   : > { %2680 = vst [vmem:[%s4712_s5 + $0x1a0] sm:$0xff] %v2620_v56  ;;  %v2621_v28 = vadd.f32 %v2580_v48, %v4707_v38  ;;  %v2582_v63 = vadd.f32 %v2581_v47, %v2469_v62  ;;  %v2563_v31 = vpop.f32.mrf.mxu0  ;;  %v2481_v48 = vadd.f32 %v5135_v5, %v2128_v17 }
 0x1f6   : > { %v2583_v34 = vpop.f32.mrf.mxu1  ;;  %2665 = vst [vmem:[%s4712_s5 + $0x128] sm:$0xff] %v2613_v8  ;;  %v2614_v9 = vadd.f32 %v2562_v51, %v4701_v3  ;;  %v2564_v52 = vadd.f32 %v2563_v31, %v2451_v14 }
 0x1f7   : > { %2681 = vst [vmem:[%s4712_s5 + $0x1a8] sm:$0xff] %v2621_v28  ;;  %v2622_v49 = vadd.f32 %v2582_v63, %v4701_v3  ;;  %v2584_v57 = vadd.f32 %v2583_v34, %v2471_v12  ;;  %v2567_v43 = vpop.f32.mrf.mxu0 }
 0x1f8   : > { %v2587_v35 = vpop.f32.mrf.mxu1  ;;  %2666 = vst [vmem:[%s4712_s5 + $0x130] sm:$0xff] %v2614_v9  ;;  %v2615_v20 = vadd.f32 %v2564_v52, %v4707_v38  ;;  %v2568_v1 = vadd.f32 %v2567_v43, %v2455_v45 }
 0x1f9   : > { %2682 = vst [vmem:[%s4712_s5 + $0x1b0] sm:$0xff] %v2622_v49  ;;  %v2623_v10 = vadd.f32 %v2584_v57, %v4707_v38  ;;  %v2588_v21 = vadd.f32 %v2587_v35, %v2475_v42  ;;  %v2569_v22 = vpop.f32.mrf.mxu0 }
 0x1fa   : > { %v2589_v62 = vpop.f32.mrf.mxu1  ;;  %2667 = vst [vmem:[%s4712_s5 + $0x138] sm:$0xff] %v2615_v20  ;;  %v2616_v37 = vadd.f32 %v2568_v1, %v4701_v3  ;;  %v2570_v55 = vadd.f32 %v2569_v22, %v2457_v54 }
 0x1fb   : > { %2683 = vst [vmem:[%s4712_s5 + $0x1b8] sm:$0xff] %v2623_v10  ;;  %v2624_v58 = vadd.f32 %v2588_v21, %v4701_v3  ;;  %v2590_v56 = vadd.f32 %v2589_v62, %v2477_v18  ;;  %v2571_v32 = vpop.f32.mrf.mxu0 }
 0x1fc   : > { %v2591_v41 = vpop.f32.mrf.mxu1  ;;  %2672 = vst [vmem:[%s4712_s5 + $0x160] sm:$0xff] %v2616_v37  ;;  %v2617_v7 = vadd.f32 %v2570_v55, %v4707_v38  ;;  %v2572_v26 = vadd.f32 %v2571_v32, %v2459_v50 }
 0x1fd   : > { %2688 = vst [vmem:[%s4712_s5 + $0x1e0] sm:$0xff] %v2624_v58  ;;  %v2625_v25 = vadd.f32 %v2590_v56, %v4707_v38  ;;  %v2592_v39 = vadd.f32 %v2591_v41, %v2479_v44  ;;  %v2573_v0 = vpop.f32.mrf.mxu0 }
 0x1fe   : > { %v2593_v19 = vpop.f32.mrf.mxu1  ;;  %2673 = vst [vmem:[%s4712_s5 + $0x168] sm:$0xff] %v2617_v7  ;;  %v2618_v36 = vadd.f32 %v2572_v26, %v4701_v3  ;;  %v2574_v14 = vadd.f32 %v2573_v0, %v2461_v4 }
 0x1ff   : > { %2689 = vst [vmem:[%s4712_s5 + $0x1e8] sm:$0xff] %v2625_v25  ;;  %v2626_v5 = vadd.f32 %v2592_v39, %v4701_v3  ;;  %v2594_v12 = vadd.f32 %v2593_v19, %v2481_v48 }
 0x200   : > { %2674 = vst [vmem:[%s4712_s5 + $0x170] sm:$0xff] %v2618_v36  ;;  %v2619_v24 = vadd.f32 %v2574_v14, %v4707_v38 }
 0x201   : > { %2690 = vst [vmem:[%s4712_s5 + $0x1f0] sm:$0xff] %v2626_v5  ;;  %v2627_v47 = vadd.f32 %v2594_v12, %v4707_v38 }
 0x202   : > { %2675 = vst [vmem:[%s4712_s5 + $0x178] sm:$0xff] %v2619_v24 }
 0x203   : > { %2691 = vst [vmem:[%s4712_s5 + $0x1f8] sm:$0xff] %v2627_v47 }
 0x204 PF: > { %s13_s16 = sadd.s32 1, %s3568_s16   ;;  %s5343_s12 = smov %s3560_s14 }
 0x205   : > { %p10_p7 = scmp.ge.s32.totalorder %s13_s16, 6   ;;  %s5344_s13 = smov %s3564_s15 }
 0x206   : > { %s5345_s14 = smov %s5348_s17  ;;  %s5346_s15 = smov %s5352_s18 }
 0x207   :  { %12 = sbr.rel (!%p10_p7) target bundleno = 3 (0x3), region = 66 }

</bundles_post_ra>
